<compile_context>
chip_gen: v7x
topology: tpu7x:2x2x1
jax: 0.10.0
libtpu: 0.0.40
codegen_flags: <defaults>
</compile_context>

<pallas_src>
import functools
import math

import jax
import jax.numpy as jnp
from jax.experimental import pallas as pl
from jax.experimental.pallas import tpu as pltpu


# ------------------------------ helpers ------------------------------------

def _round_up(x, m):
    return ((x + m - 1) // m) * m


@functools.lru_cache(maxsize=None)
def _vmem_limit_bytes():
    """Generation-aware scoped-VMEM limit: headroom on v7x (64 MiB physical),
    more of the 128 MiB parts (v5e/v6e)."""
    try:
        cap = int(pltpu.get_tpu_info().vmem_capacity_bytes)
    except Exception:
        cap = 64 * 1024 * 1024
    if cap >= 96 * 1024 * 1024:
        return 100 * 1024 * 1024
    return 44 * 1024 * 1024


def _largest_divisor(dim, cap, step):
    d = (cap // step) * step
    while d >= step:
        if dim % d == 0:
            return d
        d -= step
    return dim


def _pick_tile(dim, candidates, *, full_max, align):
    """Largest candidate dividing dim; else full extent if small enough; else
    the largest `align`-aligned divisor <= max(candidates).  Never produces a
    block that blows VMEM for large awkward dims (e.g. B*197 tokens)."""
    for c in candidates:
        if dim % c == 0:
            return c
    if dim <= full_max:
        return dim
    return _largest_divisor(dim, max(candidates), align)


def _heads_per_step(num_heads, head_dim):
    """Smallest head-group size whose combined lane width is 128-aligned
    (falls back to all heads, i.e. a full-E output block)."""
    for g in range(1, num_heads + 1):
        if num_heads % g == 0 and (g * head_dim) % 128 == 0:
            return g
    return num_heads


# ----------------------------- Pallas kernels ------------------------------

def _make_matmul_kernel(*, ln, act, residual, nk, ln_cache):
    """Fused [LayerNorm ->] matmul + bias [+ GELU] [+ residual] kernel."""

    def kernel(*refs):
        it = iter(refs)
        x_ref = next(it)
        g_ref = next(it) if ln else None
        bln_ref = next(it) if ln else None
        w_ref = next(it)
        b_ref = next(it)
        res_ref = next(it) if residual else None
        o_ref = next(it)
        xn_ref = next(it) if ln_cache else None
        acc_ref = next(it) if nk > 1 else None

        def normalize():
            # LayerNorm statistics in f32 (matches nn.LayerNorm, eps=1e-5).
            xf = x_ref[...].astype(jnp.float32)
            mean = jnp.mean(xf, axis=-1, keepdims=True)
            var = jnp.mean(jnp.square(xf - mean), axis=-1, keepdims=True)
            xf = (xf - mean) * jax.lax.rsqrt(var + jnp.float32(1e-5))
            xf = xf * g_ref[...].astype(jnp.float32) + bln_ref[...].astype(jnp.float32)
            return xf.astype(jnp.bfloat16)

        if ln:
            if ln_cache:
                # Compute LN once per M tile (first N tile) and reuse the
                # cached normalized activations for the remaining N tiles.
                @pl.when(pl.program_id(1) == 0)
                def _():
                    xn_ref[...] = normalize()

                xb = xn_ref[...]
            else:
                xb = normalize()
        else:
            xb = x_ref[...].astype(jnp.bfloat16)

        # bf16 MXU inputs, f32 accumulation.
        contrib = jnp.dot(xb, w_ref[...].astype(jnp.bfloat16),
                          preferred_element_type=jnp.float32)

        def finalize(acc):
            y = acc + b_ref[...].astype(jnp.float32)
            if act == "gelu":
                # exact (erf) GELU, matching torch.nn.GELU(approximate='none')
                y = 0.5 * y * (1.0 + jax.lax.erf(y * jnp.float32(1.0 / math.sqrt(2.0))))
            if residual:
                y = y + res_ref[...].astype(jnp.float32)
            o_ref[...] = y.astype(o_ref.dtype)

        if nk > 1:
            kk = pl.program_id(2)

            @pl.when(kk == 0)
            def _init():
                acc_ref[...] = jnp.zeros_like(acc_ref)

            acc_ref[...] += contrib

            @pl.when(kk == nk - 1)
            def _fin():
                finalize(acc_ref[...])
        else:
            finalize(contrib)

    return kernel


def fused_matmul(x, w, b, *, gamma=None, beta=None, residual=None,
                 activation="none", out_dtype=jnp.bfloat16):
    """y = [residual +] act( [LN(x)] @ w + b ).

    x: (M, K); w: (K, N); b: (N,); gamma/beta: (K,) enable fused LayerNorm;
    residual: (M, N).  Tiled over (M, N, K) with an f32 VMEM accumulator when
    K is split; LN fusion requires the full K per block and caches the
    normalized activations across N tiles.
    """
    M, K = x.shape
    K2, N = w.shape
    assert K2 == K
    ln = gamma is not None

    # tm capped at 256 when LN is fused (keeps the (tm, K) f32 LN working set
    # near the vreg file); never falls back to a huge full-extent block.
    tm = _pick_tile(M, (256, 128) if ln else (512, 256, 128),
                    full_max=512 if ln else 1024, align=8)
    tn = _pick_tile(N, (512, 256, 128), full_max=2048, align=128)
    tk = K if ln else next((c for c in (512, 256) if K % c == 0), K)
    nk = K // tk
    nj = N // tn
    ln_cache = ln and nj > 1
    grid = (M // tm, nj, nk)

    in_specs = [pl.BlockSpec((tm, tk), lambda i, j, k: (i, k))]
    args = [x]
    if ln:
        in_specs += [pl.BlockSpec((1, K), lambda i, j, k: (0, 0)),
                     pl.BlockSpec((1, K), lambda i, j, k: (0, 0))]
        args += [gamma.reshape(1, K).astype(jnp.float32),
                 beta.reshape(1, K).astype(jnp.float32)]
    in_specs += [pl.BlockSpec((tk, tn), lambda i, j, k: (k, j)),
                 pl.BlockSpec((1, tn), lambda i, j, k: (0, j))]
    args += [w, b.reshape(1, N)]
    if residual is not None:
        in_specs.append(pl.BlockSpec((tm, tn), lambda i, j, k: (i, j)))
        args.append(residual)

    out_spec = pl.BlockSpec((tm, tn), lambda i, j, k: (i, j))
    scratch = []
    if ln_cache:
        scratch.append(pltpu.VMEM((tm, K), jnp.bfloat16))
    if nk > 1:
        scratch.append(pltpu.VMEM((tm, tn), jnp.float32))

    # N axis must stay sequential on one core when the LN cache is used; M
    # stays "parallel" so megacore (v7x) still has an axis to shard.
    n_sem = "arbitrary" if ln_cache else "parallel"

    kernel = _make_matmul_kernel(ln=ln, act=activation,
                                 residual=residual is not None, nk=nk,
                                 ln_cache=ln_cache)
    return pl.pallas_call(
        kernel,
        out_shape=jax.ShapeDtypeStruct((M, N), out_dtype),
        grid=grid,
        in_specs=in_specs,
        out_specs=out_spec,
        scratch_shapes=scratch,
        compiler_params=pltpu.CompilerParams(
            dimension_semantics=("parallel", n_sem, "arbitrary"),
            vmem_limit_bytes=_vmem_limit_bytes()),
    )(*args)


def _attention_kernel(qkv_ref, o_ref, *, hp, head_dim, s_valid):
    """One (batch, head-group) step.  q/k/v are ref-sliced per head from the
    (3, 1, hp, S, D) tile (no whole-qkv value load); scores use a transposed
    contraction (no explicit k.T); each head's output is stored directly at
    its lane offset.  Padded key positions (>= s_valid) are masked.
    The 1/sqrt(D) scale is already folded into the q projection weights."""
    S = o_ref.shape[1]
    need_mask = s_valid < S
    if need_mask:
        key_valid = jax.lax.broadcasted_iota(jnp.int32, (S, S), 1) < s_valid

    for h in range(hp):
        q = qkv_ref[0, 0, h]                       # (S, D) bf16
        k = qkv_ref[1, 0, h]
        v = qkv_ref[2, 0, h]
        s = jax.lax.dot_general(q, k, (((1,), (1,)), ((), ())),
                                preferred_element_type=jnp.float32)   # (S, S)
        if need_mask:
            s = jnp.where(key_valid, s, jnp.float32(-1e30))
        m = jnp.max(s, axis=-1, keepdims=True)
        p = jnp.exp(s - m)
        p = p * pl.reciprocal(jnp.sum(p, axis=-1, keepdims=True), approx=True)
        out = jnp.dot(p.astype(jnp.bfloat16), v,
                      preferred_element_type=jnp.float32)             # (S, D)
        o_ref[0, :, h * head_dim:(h + 1) * head_dim] = out.astype(o_ref.dtype)


def attention(qkv, B, S_pad, E, num_heads, s_valid):
    """qkv: (B*S_pad, 3E) packed q|k|v.  Returns (B, S_pad, E) bf16."""
    D = E // num_heads
    hp = _heads_per_step(num_heads, D)
    G = num_heads // hp
    # One cheap XLA transpose to a head-separable, lane-aligned layout.
    qkv5 = qkv.reshape(B, S_pad, 3, num_heads, D).transpose(2, 0, 3, 1, 4)
    kern = functools.partial(_attention_kernel, hp=hp, head_dim=D, s_valid=s_valid)
    return pl.pallas_call(
        kern,
        out_shape=jax.ShapeDtypeStruct((B, S_pad, E), jnp.bfloat16),
        grid=(B, G),
        in_specs=[pl.BlockSpec((3, 1, hp, S_pad, D), lambda b, g: (0, b, g, 0, 0))],
        out_specs=pl.BlockSpec((1, S_pad, hp * D), lambda b, g: (b, 0, g)),
        compiler_params=pltpu.CompilerParams(
            dimension_semantics=("parallel", "parallel"),
            vmem_limit_bytes=_vmem_limit_bytes()),
    )(qkv5)


# ------------------------------ model glue ---------------------------------

def extract_patches(x, patch_size):
    """NCHW -> (B, N_patches, C*p*p) in the same element order as Conv2d weights."""
    B, C, H, W = x.shape
    p = patch_size
    hp, wp = H // p, W // p
    x = x.reshape(B, C, hp, p, wp, p)
    x = x.transpose(0, 2, 4, 1, 3, 5)           # (B, hp, wp, C, p, p)
    return x.reshape(B, hp * wp, C * p * p)


def encoder_block(x2, p, B, S_pad, E, num_heads, s_valid):
    # --- MultiHeadSelfAttentionBlock (LN fused into QKV proj, residual fused
    #     into the output projection epilogue) ---
    qkv = fused_matmul(x2, p["in_proj_w_t"], p["in_proj_b"],
                       gamma=p["ln1_g"], beta=p["ln1_b"])          # (B*S, 3E)
    attn = attention(qkv, B, S_pad, E, num_heads, s_valid)         # (B, S, E)
    x2 = fused_matmul(attn.reshape(B * S_pad, E), p["out_proj_w_t"],
                      p["out_proj_b"], residual=x2)                # attn_out + x

    # --- MultiLayerPerceptronBlock (LN fused into fc1, residual fused into fc2) ---
    h = fused_matmul(x2, p["fc1_w_t"], p["fc1_b"],
                     gamma=p["ln2_g"], beta=p["ln2_b"], activation="gelu")
    x2 = fused_matmul(h, p["fc2_w_t"], p["fc2_b"], residual=x2)    # mlp_out + x
    return x2


def vit_forward(x, params, cfg):
    B = x.shape[0]
    p, E, H = cfg["patch_size"], cfg["embedding_dim"], cfg["num_heads"]
    NC = cfg["num_classes"]

    # Patch embedding (Conv2d k=s=p, padding=0) as im2col + Pallas matmul (bf16 out).
    patches = extract_patches(x, p)                                # (B, N, C*p*p)
    Np, CPP = patches.shape[1], patches.shape[2]
    pe = fused_matmul(patches.reshape(B * Np, CPP), params["patch_w"],
                      params["patch_b"])                           # bf16
    pe = pe.reshape(B, Np, E)

    # cls concat + positional add in bf16 (residual stream is bf16).
    cls = jnp.broadcast_to(params["cls_token"].astype(jnp.bfloat16), (B, 1, E))
    tokens = jnp.concatenate([cls, pe], axis=1) + params["pos_emb"].astype(jnp.bfloat16)
    # TODO(synk): embedding/attn/mlp dropout layers are identity (eval-mode semantics).

    # Pad tokens so B*S_pad tiles cleanly (bf16 sublane packing / 128-row tiles);
    # padded keys are masked inside the attention kernel.
    S = Np + 1
    S_pad = _round_up(S, 16)
    if S_pad != S:
        tokens = jnp.pad(tokens, ((0, 0), (0, S_pad - S), (0, 0)))

    x2 = tokens.reshape(B * S_pad, E)
    for layer_params in params["layers"]:
        x2 = encoder_block(x2, layer_params, B, S_pad, E, H, S)

    cls_tok = x2.reshape(B, S_pad, E)[:, 0, :]                     # (B, E)
    # classifier = LayerNorm + Linear (lane-padded to 128 classes), one kernel.
    logits = fused_matmul(cls_tok, params["head_w_t"], params["head_b"],
                          gamma=params["head_ln_g"], beta=params["head_ln_b"],
                          out_dtype=jnp.float32)
    return logits[:, :NC]


# --------------------------- parameter creation -----------------------------

def init_params(key, cfg):
    C, p, E = cfg["in_channels"], cfg["patch_size"], cfg["embedding_dim"]
    mlp, L, NC = cfg["mlp_size"], cfg["num_layers"], cfg["num_classes"]
    H = cfg["num_heads"]
    n_patches = (cfg["img_size"] // p) ** 2
    scale = 1.0 / math.sqrt(E // H)
    NC_pad = max(128, _round_up(NC, 128))

    def nrm(k, shape, s=0.02):
        return (s * jax.random.normal(k, shape)).astype(jnp.float32)

    keys = iter(jax.random.split(key, 16 + 8 * L))
    head_w = nrm(next(keys), (NC, E))
    head_b = nrm(next(keys), (NC,))
    params = {
        # Conv2d weight (E, C, p, p) flattened & transposed to (C*p*p, E); bf16 for the MXU.
        "patch_w": nrm(next(keys), (E, C * p * p)).T.astype(jnp.bfloat16),
        "patch_b": nrm(next(keys), (E,)),
        "cls_token": nrm(next(keys), (1, 1, E), s=1.0),
        "pos_emb": nrm(next(keys), (1, n_patches + 1, E), s=1.0),
        "head_ln_g": jnp.ones((E,), jnp.float32),
        "head_ln_b": jnp.zeros((E,), jnp.float32),
        # Linear(E, NC): weight stored transposed, lane-padded to 128 classes.
        "head_w_t": jnp.zeros((E, NC_pad), jnp.bfloat16).at[:, :NC].set(
            head_w.T.astype(jnp.bfloat16)),
        "head_b": jnp.zeros((NC_pad,), jnp.float32).at[:NC].set(head_b),
        "layers": [],
    }
    for _ in range(L):
        # MultiheadAttention in_proj: fold the 1/sqrt(head_dim) attention scale
        # into the q rows of the projection (mathematically identical).
        w_qkv = nrm(next(keys), (3 * E, E))
        b_qkv = nrm(next(keys), (3 * E,))
        w_qkv = w_qkv.at[:E].multiply(scale)
        b_qkv = b_qkv.at[:E].multiply(scale)
        params["layers"].append({
            "ln1_g": jnp.ones((E,), jnp.float32),
            "ln1_b": jnp.zeros((E,), jnp.float32),
            "in_proj_w_t": w_qkv.T.astype(jnp.bfloat16),
            "in_proj_b": b_qkv,
            "out_proj_w_t": nrm(next(keys), (E, E)).T.astype(jnp.bfloat16),
            "out_proj_b": nrm(next(keys), (E,)),
            "ln2_g": jnp.ones((E,), jnp.float32),
            "ln2_b": jnp.zeros((E,), jnp.float32),
            "fc1_w_t": nrm(next(keys), (mlp, E)).T.astype(jnp.bfloat16),
            "fc1_b": nrm(next(keys), (mlp,)),
            "fc2_w_t": nrm(next(keys), (E, mlp)).T.astype(jnp.bfloat16),
            "fc2_b": nrm(next(keys), (E,)),
        })
    return params


# --------------------------------- main -------------------------------------

if __name__ == "__main__":
    cfg = dict(
        img_size=16,
        in_channels=3,
        patch_size=4,
        num_layers=2,
        embedding_dim=32,
        mlp_size=64,
        num_heads=4,
        num_classes=10,
    )

    key = jax.random.PRNGKey(0)
    k_params, k_x = jax.random.split(key)
    params = init_params(k_params, cfg)

    batch = 2
    x = jax.random.normal(
        k_x, (batch, cfg["in_channels"], cfg["img_size"], cfg["img_size"]), jnp.float32
    )

    fwd = jax.jit(lambda xx, pp: vit_forward(xx, pp, cfg))
    logits = fwd(x, params)
    logits = jax.block_until_ready(logits)
    assert logits.shape == (batch, cfg["num_classes"]), logits.shape
    assert bool(jnp.all(jnp.isfinite(logits)))
    print("KERNEL_OK")
</pallas_src>

<mosaic_0001>
module attributes {stable_mosaic.version = 11 : i64} {
  func.func @kernel(%arg0: i32, %arg1: i32, %arg2: i32, %arg3: memref<32x48xf32, #tpu.memory_space<vmem>>, %arg4: memref<48x32xbf16, #tpu.memory_space<vmem>>, %arg5: memref<1x32xf32, #tpu.memory_space<vmem>>, %arg6: memref<32x32xbf16, #tpu.memory_space<vmem>>) attributes {dimension_semantics = [#tpu.dimension_semantics<parallel>, #tpu.dimension_semantics<parallel>, #tpu.dimension_semantics<arbitrary>], iteration_bounds = array<i64: 1, 1, 1>, scalar_prefetch = 0 : i64, scratch_operands = 0 : i64, tpu.core_type = #tpu.core_type<tc>, window_params = [{transform_indices = @transform_0, window_bounds = array<i64: 32, 48>}, {transform_indices = @transform_1, window_bounds = array<i64: 48, 32>}, {transform_indices = @transform_2, window_bounds = array<i64: 1, 32>}, {transform_indices = @transform_3, window_bounds = array<i64: 32, 32>}]} {
    %c0 = arith.constant 0 : index
    %c0_0 = arith.constant 0 : index
    %0 = vector.load %arg3[%c0, %c0_0] : memref<32x48xf32, #tpu.memory_space<vmem>>, vector<32x48xf32>
    %1 = arith.truncf %0 : vector<32x48xf32> to vector<32x48xbf16>
    %c0_1 = arith.constant 0 : index
    %c0_2 = arith.constant 0 : index
    %2 = vector.load %arg4[%c0_1, %c0_2] : memref<48x32xbf16, #tpu.memory_space<vmem>>, vector<48x32xbf16>
    %cst = arith.constant dense<0.000000e+00> : vector<32x32xf32>
    %3 = tpu.matmul %1, %2, %cst {dimension_numbers = #tpu.dot_dimension_numbers<[1], [0], [0], [1], [0, 0, 1, 1], [], []>} : vector<32x48xbf16>, vector<48x32xbf16>, vector<32x32xf32> -> vector<32x32xf32>
    %c0_3 = arith.constant 0 : index
    %c0_4 = arith.constant 0 : index
    %4 = vector.load %arg5[%c0_3, %c0_4] : memref<1x32xf32, #tpu.memory_space<vmem>>, vector<1x32xf32>
    %5 = vector.broadcast %4 : vector<1x32xf32> to vector<32x32xf32>
    %6 = arith.addf %3, %5 : vector<32x32xf32>
    %7 = arith.truncf %6 : vector<32x32xf32> to vector<32x32xbf16>
    %c0_5 = arith.constant 0 : index
    %c0_6 = arith.constant 0 : index
    %8 = vector.load %arg6[%c0_5, %c0_6] : memref<32x32xbf16, #tpu.memory_space<vmem>>, vector<32x32xbf16>
    tpu.vector_store %arg6[%c0_5, %c0_6], %7 {strides = array<i32>} : memref<32x32xbf16, #tpu.memory_space<vmem>>, vector<32x32xbf16>,
    return
  }
  func.func @transform_0(%arg0: i32, %arg1: i32, %arg2: i32) -> (i32, i32) {
    %c0_i32 = arith.constant 0 : i32
    return %arg0, %arg2 : i32, i32
  }
  func.func @transform_1(%arg0: i32, %arg1: i32, %arg2: i32) -> (i32, i32) {
    %c0_i32 = arith.constant 0 : i32
    return %arg2, %arg1 : i32, i32
  }
  func.func @transform_2(%arg0: i32, %arg1: i32, %arg2: i32) -> (i32, i32) {
    %c0_i32 = arith.constant 0 : i32
    %c0_i32_0 = arith.constant 0 : i32
    return %c0_i32, %arg1 : i32, i32
  }
  func.func @transform_3(%arg0: i32, %arg1: i32, %arg2: i32) -> (i32, i32) {
    %c0_i32 = arith.constant 0 : i32
    return %arg0, %arg1 : i32, i32
  }
}

module attributes {stable_mosaic.version = 11 : i64} {
  func.func @kernel(%arg0: i32, %arg1: i32, %arg2: i32, %arg3: memref<64x32xbf16, #tpu.memory_space<vmem>>, %arg4: memref<1x32xf32, #tpu.memory_space<vmem>>, %arg5: memref<1x32xf32, #tpu.memory_space<vmem>>, %arg6: memref<32x96xbf16, #tpu.memory_space<vmem>>, %arg7: memref<1x96xf32, #tpu.memory_space<vmem>>, %arg8: memref<64x96xbf16, #tpu.memory_space<vmem>>) attributes {dimension_semantics = [#tpu.dimension_semantics<parallel>, #tpu.dimension_semantics<parallel>, #tpu.dimension_semantics<arbitrary>], iteration_bounds = array<i64: 1, 1, 1>, scalar_prefetch = 0 : i64, scratch_operands = 0 : i64, tpu.core_type = #tpu.core_type<tc>, window_params = [{transform_indices = @transform_0, window_bounds = array<i64: 64, 32>}, {pipeline_mode = #tpu.pipeline_mode<synchronous>, transform_indices = @transform_1, window_bounds = array<i64: 1, 32>}, {pipeline_mode = #tpu.pipeline_mode<synchronous>, transform_indices = @transform_2, window_bounds = array<i64: 1, 32>}, {transform_indices = @transform_3, window_bounds = array<i64: 32, 96>}, {transform_indices = @transform_4, window_bounds = array<i64: 1, 96>}, {transform_indices = @transform_5, window_bounds = array<i64: 64, 96>}]} {
    %c0 = arith.constant 0 : index
    %c0_0 = arith.constant 0 : index
    %0 = vector.load %arg3[%c0, %c0_0] : memref<64x32xbf16, #tpu.memory_space<vmem>>, vector<64x32xbf16>
    %1 = arith.extf %0 : vector<64x32xbf16> to vector<64x32xf32>
    %cst = arith.constant dense<0.000000e+00> : vector<64xf32>
    %2 = vector.multi_reduction <add>, %1, %cst [1] : vector<64x32xf32> to vector<64xf32>
    %3 = vector.shape_cast %2 : vector<64xf32> to vector<64x1xf32>
    %cst_1 = arith.constant 3.200000e+01 : f32
    %4 = vector.broadcast %cst_1 : f32 to vector<64x1xf32>
    %5 = arith.divf %3, %4 : vector<64x1xf32>
    %6 = vector.broadcast %5 : vector<64x1xf32> to vector<64x32xf32>
    %7 = arith.subf %1, %6 : vector<64x32xf32>
    %8 = arith.mulf %7, %7 : vector<64x32xf32>
    %cst_2 = arith.constant dense<0.000000e+00> : vector<64xf32>
    %9 = vector.multi_reduction <add>, %8, %cst_2 [1] : vector<64x32xf32> to vector<64xf32>
    %10 = vector.shape_cast %9 : vector<64xf32> to vector<64x1xf32>
    %cst_3 = arith.constant 3.200000e+01 : f32
    %11 = vector.broadcast %cst_3 : f32 to vector<64x1xf32>
    %12 = arith.divf %10, %11 : vector<64x1xf32>
    %13 = vector.broadcast %5 : vector<64x1xf32> to vector<64x32xf32>
    %14 = arith.subf %1, %13 : vector<64x32xf32>
    %cst_4 = arith.constant 9.99999974E-6 : f32
    %15 = vector.broadcast %cst_4 : f32 to vector<64x1xf32>
    %16 = arith.addf %12, %15 : vector<64x1xf32>
    %17 = math.rsqrt %16 : vector<64x1xf32>
    %18 = vector.broadcast %17 : vector<64x1xf32> to vector<64x32xf32>
    %19 = arith.mulf %14, %18 : vector<64x32xf32>
    %c0_5 = arith.constant 0 : index
    %c0_6 = arith.constant 0 : index
    %20 = vector.load %arg4[%c0_5, %c0_6] : memref<1x32xf32, #tpu.memory_space<vmem>>, vector<1x32xf32>
    %21 = vector.broadcast %20 : vector<1x32xf32> to vector<64x32xf32>
    %22 = arith.mulf %19, %21 : vector<64x32xf32>
    %c0_7 = arith.constant 0 : index
    %c0_8 = arith.constant 0 : index
    %23 = vector.load %arg5[%c0_7, %c0_8] : memref<1x32xf32, #tpu.memory_space<vmem>>, vector<1x32xf32>
    %24 = vector.broadcast %23 : vector<1x32xf32> to vector<64x32xf32>
    %25 = arith.addf %22, %24 : vector<64x32xf32>
    %26 = arith.truncf %25 : vector<64x32xf32> to vector<64x32xbf16>
    %c0_9 = arith.constant 0 : index
    %c0_10 = arith.constant 0 : index
    %27 = vector.load %arg6[%c0_9, %c0_10] : memref<32x96xbf16, #tpu.memory_space<vmem>>, vector<32x96xbf16>
    %cst_11 = arith.constant dense<0.000000e+00> : vector<64x96xf32>
    %28 = tpu.matmul %26, %27, %cst_11 {dimension_numbers = #tpu.dot_dimension_numbers<[1], [0], [0], [1], [0, 0, 1, 1], [], []>} : vector<64x32xbf16>, vector<32x96xbf16>, vector<64x96xf32> -> vector<64x96xf32>
    %c0_12 = arith.constant 0 : index
    %c0_13 = arith.constant 0 : index
    %29 = vector.load %arg7[%c0_12, %c0_13] : memref<1x96xf32, #tpu.memory_space<vmem>>, vector<1x96xf32>
    %30 = vector.broadcast %29 : vector<1x96xf32> to vector<64x96xf32>
    %31 = arith.addf %28, %30 : vector<64x96xf32>
    %32 = arith.truncf %31 : vector<64x96xf32> to vector<64x96xbf16>
    %c0_14 = arith.constant 0 : index
    %c0_15 = arith.constant 0 : index
    %33 = vector.load %arg8[%c0_14, %c0_15] : memref<64x96xbf16, #tpu.memory_space<vmem>>, vector<64x96xbf16>
    tpu.vector_store %arg8[%c0_14, %c0_15], %32 {strides = array<i32>} : memref<64x96xbf16, #tpu.memory_space<vmem>>, vector<64x96xbf16>,
    return
  }
  func.func @transform_0(%arg0: i32, %arg1: i32, %arg2: i32) -> (i32, i32) {
    %c0_i32 = arith.constant 0 : i32
    return %arg0, %arg2 : i32, i32
  }
  func.func @transform_1(%arg0: i32, %arg1: i32, %arg2: i32) -> (i32, i32) {
    %c0_i32 = arith.constant 0 : i32
    %c0_i32_0 = arith.constant 0 : i32
    %c0_i32_1 = arith.constant 0 : i32
    return %c0_i32, %c0_i32_0 : i32, i32
  }
  func.func @transform_2(%arg0: i32, %arg1: i32, %arg2: i32) -> (i32, i32) {
    %c0_i32 = arith.constant 0 : i32
    %c0_i32_0 = arith.constant 0 : i32
    %c0_i32_1 = arith.constant 0 : i32
    return %c0_i32, %c0_i32_0 : i32, i32
  }
  func.func @transform_3(%arg0: i32, %arg1: i32, %arg2: i32) -> (i32, i32) {
    %c0_i32 = arith.constant 0 : i32
    return %arg2, %arg1 : i32, i32
  }
  func.func @transform_4(%arg0: i32, %arg1: i32, %arg2: i32) -> (i32, i32) {
    %c0_i32 = arith.constant 0 : i32
    %c0_i32_0 = arith.constant 0 : i32
    return %c0_i32, %arg1 : i32, i32
  }
  func.func @transform_5(%arg0: i32, %arg1: i32, %arg2: i32) -> (i32, i32) {
    %c0_i32 = arith.constant 0 : i32
    return %arg0, %arg1 : i32, i32
  }
}

module attributes {stable_mosaic.version = 11 : i64} {
  func.func @_attention_kernel(%arg0: i32, %arg1: i32, %arg2: memref<3x1x4x32x8xbf16, #tpu.memory_space<vmem>>, %arg3: memref<1x32x32xbf16, #tpu.memory_space<vmem>>) attributes {dimension_semantics = [#tpu.dimension_semantics<parallel>, #tpu.dimension_semantics<parallel>], iteration_bounds = array<i64: 2, 1>, scalar_prefetch = 0 : i64, scratch_operands = 0 : i64, tpu.core_type = #tpu.core_type<tc>, window_params = [{transform_indices = @transform_0, window_bounds = array<i64: 3, 1, 4, 32, 8>}, {transform_indices = @transform_1, window_bounds = array<i64: 1, 32, 32>}]} {
    %0 = tpu.iota {dimensions = array<i32: 1>} : vector<32x32xi32>
    %c17_i32 = arith.constant 17 : i32
    %1 = vector.broadcast %c17_i32 : i32 to vector<32x32xi32>
    %2 = arith.cmpi slt, %0, %1 : vector<32x32xi32>
    %c0 = arith.constant 0 : index
    %c0_0 = arith.constant 0 : index
    %c0_1 = arith.constant 0 : index
    %c0_2 = arith.constant 0 : index
    %c0_3 = arith.constant 0 : index
    %3 = vector.load %arg2[%c0, %c0_0, %c0_1, %c0_2, %c0_3] : memref<3x1x4x32x8xbf16, #tpu.memory_space<vmem>>, vector<1x1x1x32x8xbf16>
    %4 = vector.shape_cast %3 : vector<1x1x1x32x8xbf16> to vector<32x8xbf16>
    %c1 = arith.constant 1 : index
    %c0_4 = arith.constant 0 : index
    %c0_5 = arith.constant 0 : index
    %c0_6 = arith.constant 0 : index
    %c0_7 = arith.constant 0 : index
    %5 = vector.load %arg2[%c1, %c0_4, %c0_5, %c0_6, %c0_7] : memref<3x1x4x32x8xbf16, #tpu.memory_space<vmem>>, vector<1x1x1x32x8xbf16>
    %6 = vector.shape_cast %5 : vector<1x1x1x32x8xbf16> to vector<32x8xbf16>
    %c2 = arith.constant 2 : index
    %c0_8 = arith.constant 0 : index
    %c0_9 = arith.constant 0 : index
    %c0_10 = arith.constant 0 : index
    %c0_11 = arith.constant 0 : index
    %7 = vector.load %arg2[%c2, %c0_8, %c0_9, %c0_10, %c0_11] : memref<3x1x4x32x8xbf16, #tpu.memory_space<vmem>>, vector<1x1x1x32x8xbf16>
    %8 = vector.shape_cast %7 : vector<1x1x1x32x8xbf16> to vector<32x8xbf16>
    %cst = arith.constant dense<0.000000e+00> : vector<32x32xf32>
    %9 = tpu.matmul %4, %6, %cst {dimension_numbers = #tpu.dot_dimension_numbers<[1], [1], [0], [0], [0, 0, 1, 0], [], []>} : vector<32x8xbf16>, vector<32x8xbf16>, vector<32x32xf32> -> vector<32x32xf32>
    %cst_12 = arith.constant -1.000000e+30 : f32
    %10 = vector.broadcast %cst_12 : f32 to vector<32x32xf32>
    %11 = arith.select %2, %9, %10 : vector<32x32xi1>, vector<32x32xf32>
    %cst_13 = arith.constant dense<0xFF800000> : vector<32xf32>
    %12 = vector.multi_reduction <maximumf>, %11, %cst_13 [1] : vector<32x32xf32> to vector<32xf32>
    %13 = vector.shape_cast %12 : vector<32xf32> to vector<32x1xf32>
    %14 = vector.broadcast %13 : vector<32x1xf32> to vector<32x32xf32>
    %15 = arith.subf %11, %14 : vector<32x32xf32>
    %16 = math.exp %15 : vector<32x32xf32>
    %cst_14 = arith.constant dense<0.000000e+00> : vector<32xf32>
    %17 = vector.multi_reduction <add>, %16, %cst_14 [1] : vector<32x32xf32> to vector<32xf32>
    %18 = vector.shape_cast %17 : vector<32xf32> to vector<32x1xf32>
    %19 = tpu.reciprocal %18 {approx = true} : vector<32x1xf32> -> vector<32x1xf32>
    %20 = vector.broadcast %19 : vector<32x1xf32> to vector<32x32xf32>
    %21 = arith.mulf %16, %20 : vector<32x32xf32>
    %22 = arith.truncf %21 : vector<32x32xf32> to vector<32x32xbf16>
    %cst_15 = arith.constant dense<0.000000e+00> : vector<32x8xf32>
    %23 = tpu.matmul %22, %8, %cst_15 {dimension_numbers = #tpu.dot_dimension_numbers<[1], [0], [0], [1], [0, 0, 1, 1], [], []>} : vector<32x32xbf16>, vector<32x8xbf16>, vector<32x8xf32> -> vector<32x8xf32>
    %24 = arith.truncf %23 : vector<32x8xf32> to vector<32x8xbf16>
    %c0_16 = arith.constant 0 : index
    %c0_17 = arith.constant 0 : index
    %c0_18 = arith.constant 0 : index
    %25 = vector.load %arg3[%c0_16, %c0_17, %c0_18] : memref<1x32x32xbf16, #tpu.memory_space<vmem>>, vector<1x32x8xbf16>
    %26 = vector.shape_cast %25 : vector<1x32x8xbf16> to vector<32x8xbf16>
    %27 = vector.shape_cast %24 : vector<32x8xbf16> to vector<1x32x8xbf16>
    tpu.vector_store %arg3[%c0_16, %c0_17, %c0_18], %27 {strides = array<i32>} : memref<1x32x32xbf16, #tpu.memory_space<vmem>>, vector<1x32x8xbf16>,
    %c0_19 = arith.constant 0 : index
    %c0_20 = arith.constant 0 : index
    %c1_21 = arith.constant 1 : index
    %c0_22 = arith.constant 0 : index
    %c0_23 = arith.constant 0 : index
    %28 = vector.load %arg2[%c0_19, %c0_20, %c1_21, %c0_22, %c0_23] : memref<3x1x4x32x8xbf16, #tpu.memory_space<vmem>>, vector<1x1x1x32x8xbf16>
    %29 = vector.shape_cast %28 : vector<1x1x1x32x8xbf16> to vector<32x8xbf16>
    %c1_24 = arith.constant 1 : index
    %c0_25 = arith.constant 0 : index
    %c1_26 = arith.constant 1 : index
    %c0_27 = arith.constant 0 : index
    %c0_28 = arith.constant 0 : index
    %30 = vector.load %arg2[%c1_24, %c0_25, %c1_26, %c0_27, %c0_28] : memref<3x1x4x32x8xbf16, #tpu.memory_space<vmem>>, vector<1x1x1x32x8xbf16>
    %31 = vector.shape_cast %30 : vector<1x1x1x32x8xbf16> to vector<32x8xbf16>
    %c2_29 = arith.constant 2 : index
    %c0_30 = arith.constant 0 : index
    %c1_31 = arith.constant 1 : index
    %c0_32 = arith.constant 0 : index
    %c0_33 = arith.constant 0 : index
    %32 = vector.load %arg2[%c2_29, %c0_30, %c1_31, %c0_32, %c0_33] : memref<3x1x4x32x8xbf16, #tpu.memory_space<vmem>>, vector<1x1x1x32x8xbf16>
    %33 = vector.shape_cast %32 : vector<1x1x1x32x8xbf16> to vector<32x8xbf16>
    %cst_34 = arith.constant dense<0.000000e+00> : vector<32x32xf32>
    %34 = tpu.matmul %29, %31, %cst_34 {dimension_numbers = #tpu.dot_dimension_numbers<[1], [1], [0], [0], [0, 0, 1, 0], [], []>} : vector<32x8xbf16>, vector<32x8xbf16>, vector<32x32xf32> -> vector<32x32xf32>
    %cst_35 = arith.constant -1.000000e+30 : f32
    %35 = vector.broadcast %cst_35 : f32 to vector<32x32xf32>
    %36 = arith.select %2, %34, %35 : vector<32x32xi1>, vector<32x32xf32>
    %cst_36 = arith.constant dense<0xFF800000> : vector<32xf32>
    %37 = vector.multi_reduction <maximumf>, %36, %cst_36 [1] : vector<32x32xf32> to vector<32xf32>
    %38 = vector.shape_cast %37 : vector<32xf32> to vector<32x1xf32>
    %39 = vector.broadcast %38 : vector<32x1xf32> to vector<32x32xf32>
    %40 = arith.subf %36, %39 : vector<32x32xf32>
    %41 = math.exp %40 : vector<32x32xf32>
    %cst_37 = arith.constant dense<0.000000e+00> : vector<32xf32>
    %42 = vector.multi_reduction <add>, %41, %cst_37 [1] : vector<32x32xf32> to vector<32xf32>
    %43 = vector.shape_cast %42 : vector<32xf32> to vector<32x1xf32>
    %44 = tpu.reciprocal %43 {approx = true} : vector<32x1xf32> -> vector<32x1xf32>
    %45 = vector.broadcast %44 : vector<32x1xf32> to vector<32x32xf32>
    %46 = arith.mulf %41, %45 : vector<32x32xf32>
    %47 = arith.truncf %46 : vector<32x32xf32> to vector<32x32xbf16>
    %cst_38 = arith.constant dense<0.000000e+00> : vector<32x8xf32>
    %48 = tpu.matmul %47, %33, %cst_38 {dimension_numbers = #tpu.dot_dimension_numbers<[1], [0], [0], [1], [0, 0, 1, 1], [], []>} : vector<32x32xbf16>, vector<32x8xbf16>, vector<32x8xf32> -> vector<32x8xf32>
    %49 = arith.truncf %48 : vector<32x8xf32> to vector<32x8xbf16>
    %c0_39 = arith.constant 0 : index
    %c0_40 = arith.constant 0 : index
    %c8 = arith.constant 8 : index
    %50 = vector.load %arg3[%c0_39, %c0_40, %c8] : memref<1x32x32xbf16, #tpu.memory_space<vmem>>, vector<1x32x8xbf16>
    %51 = vector.shape_cast %50 : vector<1x32x8xbf16> to vector<32x8xbf16>
    %52 = vector.shape_cast %49 : vector<32x8xbf16> to vector<1x32x8xbf16>
    tpu.vector_store %arg3[%c0_39, %c0_40, %c8], %52 {strides = array<i32>} : memref<1x32x32xbf16, #tpu.memory_space<vmem>>, vector<1x32x8xbf16>,
    %c0_41 = arith.constant 0 : index
    %c0_42 = arith.constant 0 : index
    %c2_43 = arith.constant 2 : index
    %c0_44 = arith.constant 0 : index
    %c0_45 = arith.constant 0 : index
    %53 = vector.load %arg2[%c0_41, %c0_42, %c2_43, %c0_44, %c0_45] : memref<3x1x4x32x8xbf16, #tpu.memory_space<vmem>>, vector<1x1x1x32x8xbf16>
    %54 = vector.shape_cast %53 : vector<1x1x1x32x8xbf16> to vector<32x8xbf16>
    %c1_46 = arith.constant 1 : index
    %c0_47 = arith.constant 0 : index
    %c2_48 = arith.constant 2 : index
    %c0_49 = arith.constant 0 : index
    %c0_50 = arith.constant 0 : index
    %55 = vector.load %arg2[%c1_46, %c0_47, %c2_48, %c0_49, %c0_50] : memref<3x1x4x32x8xbf16, #tpu.memory_space<vmem>>, vector<1x1x1x32x8xbf16>
    %56 = vector.shape_cast %55 : vector<1x1x1x32x8xbf16> to vector<32x8xbf16>
    %c2_51 = arith.constant 2 : index
    %c0_52 = arith.constant 0 : index
    %c2_53 = arith.constant 2 : index
    %c0_54 = arith.constant 0 : index
    %c0_55 = arith.constant 0 : index
    %57 = vector.load %arg2[%c2_51, %c0_52, %c2_53, %c0_54, %c0_55] : memref<3x1x4x32x8xbf16, #tpu.memory_space<vmem>>, vector<1x1x1x32x8xbf16>
    %58 = vector.shape_cast %57 : vector<1x1x1x32x8xbf16> to vector<32x8xbf16>
    %cst_56 = arith.constant dense<0.000000e+00> : vector<32x32xf32>
    %59 = tpu.matmul %54, %56, %cst_56 {dimension_numbers = #tpu.dot_dimension_numbers<[1], [1], [0], [0], [0, 0, 1, 0], [], []>} : vector<32x8xbf16>, vector<32x8xbf16>, vector<32x32xf32> -> vector<32x32xf32>
    %cst_57 = arith.constant -1.000000e+30 : f32
    %60 = vector.broadcast %cst_57 : f32 to vector<32x32xf32>
    %61 = arith.select %2, %59, %60 : vector<32x32xi1>, vector<32x32xf32>
    %cst_58 = arith.constant dense<0xFF800000> : vector<32xf32>
    %62 = vector.multi_reduction <maximumf>, %61, %cst_58 [1] : vector<32x32xf32> to vector<32xf32>
    %63 = vector.shape_cast %62 : vector<32xf32> to vector<32x1xf32>
    %64 = vector.broadcast %63 : vector<32x1xf32> to vector<32x32xf32>
    %65 = arith.subf %61, %64 : vector<32x32xf32>
    %66 = math.exp %65 : vector<32x32xf32>
    %cst_59 = arith.constant dense<0.000000e+00> : vector<32xf32>
    %67 = vector.multi_reduction <add>, %66, %cst_59 [1] : vector<32x32xf32> to vector<32xf32>
    %68 = vector.shape_cast %67 : vector<32xf32> to vector<32x1xf32>
    %69 = tpu.reciprocal %68 {approx = true} : vector<32x1xf32> -> vector<32x1xf32>
    %70 = vector.broadcast %69 : vector<32x1xf32> to vector<32x32xf32>
    %71 = arith.mulf %66, %70 : vector<32x32xf32>
    %72 = arith.truncf %71 : vector<32x32xf32> to vector<32x32xbf16>
    %cst_60 = arith.constant dense<0.000000e+00> : vector<32x8xf32>
    %73 = tpu.matmul %72, %58, %cst_60 {dimension_numbers = #tpu.dot_dimension_numbers<[1], [0], [0], [1], [0, 0, 1, 1], [], []>} : vector<32x32xbf16>, vector<32x8xbf16>, vector<32x8xf32> -> vector<32x8xf32>
    %74 = arith.truncf %73 : vector<32x8xf32> to vector<32x8xbf16>
    %c0_61 = arith.constant 0 : index
    %c0_62 = arith.constant 0 : index
    %c16 = arith.constant 16 : index
    %75 = vector.load %arg3[%c0_61, %c0_62, %c16] : memref<1x32x32xbf16, #tpu.memory_space<vmem>>, vector<1x32x8xbf16>
    %76 = vector.shape_cast %75 : vector<1x32x8xbf16> to vector<32x8xbf16>
    %77 = vector.shape_cast %74 : vector<32x8xbf16> to vector<1x32x8xbf16>
    tpu.vector_store %arg3[%c0_61, %c0_62, %c16], %77 {strides = array<i32>} : memref<1x32x32xbf16, #tpu.memory_space<vmem>>, vector<1x32x8xbf16>,
    %c0_63 = arith.constant 0 : index
    %c0_64 = arith.constant 0 : index
    %c3 = arith.constant 3 : index
    %c0_65 = arith.constant 0 : index
    %c0_66 = arith.constant 0 : index
    %78 = vector.load %arg2[%c0_63, %c0_64, %c3, %c0_65, %c0_66] : memref<3x1x4x32x8xbf16, #tpu.memory_space<vmem>>, vector<1x1x1x32x8xbf16>
    %79 = vector.shape_cast %78 : vector<1x1x1x32x8xbf16> to vector<32x8xbf16>
    %c1_67 = arith.constant 1 : index
    %c0_68 = arith.constant 0 : index
    %c3_69 = arith.constant 3 : index
    %c0_70 = arith.constant 0 : index
    %c0_71 = arith.constant 0 : index
    %80 = vector.load %arg2[%c1_67, %c0_68, %c3_69, %c0_70, %c0_71] : memref<3x1x4x32x8xbf16, #tpu.memory_space<vmem>>, vector<1x1x1x32x8xbf16>
    %81 = vector.shape_cast %80 : vector<1x1x1x32x8xbf16> to vector<32x8xbf16>
    %c2_72 = arith.constant 2 : index
    %c0_73 = arith.constant 0 : index
    %c3_74 = arith.constant 3 : index
    %c0_75 = arith.constant 0 : index
    %c0_76 = arith.constant 0 : index
    %82 = vector.load %arg2[%c2_72, %c0_73, %c3_74, %c0_75, %c0_76] : memref<3x1x4x32x8xbf16, #tpu.memory_space<vmem>>, vector<1x1x1x32x8xbf16>
    %83 = vector.shape_cast %82 : vector<1x1x1x32x8xbf16> to vector<32x8xbf16>
    %cst_77 = arith.constant dense<0.000000e+00> : vector<32x32xf32>
    %84 = tpu.matmul %79, %81, %cst_77 {dimension_numbers = #tpu.dot_dimension_numbers<[1], [1], [0], [0], [0, 0, 1, 0], [], []>} : vector<32x8xbf16>, vector<32x8xbf16>, vector<32x32xf32> -> vector<32x32xf32>
    %cst_78 = arith.constant -1.000000e+30 : f32
    %85 = vector.broadcast %cst_78 : f32 to vector<32x32xf32>
    %86 = arith.select %2, %84, %85 : vector<32x32xi1>, vector<32x32xf32>
    %cst_79 = arith.constant dense<0xFF800000> : vector<32xf32>
    %87 = vector.multi_reduction <maximumf>, %86, %cst_79 [1] : vector<32x32xf32> to vector<32xf32>
    %88 = vector.shape_cast %87 : vector<32xf32> to vector<32x1xf32>
    %89 = vector.broadcast %88 : vector<32x1xf32> to vector<32x32xf32>
    %90 = arith.subf %86, %89 : vector<32x32xf32>
    %91 = math.exp %90 : vector<32x32xf32>
    %cst_80 = arith.constant dense<0.000000e+00> : vector<32xf32>
    %92 = vector.multi_reduction <add>, %91, %cst_80 [1] : vector<32x32xf32> to vector<32xf32>
    %93 = vector.shape_cast %92 : vector<32xf32> to vector<32x1xf32>
    %94 = tpu.reciprocal %93 {approx = true} : vector<32x1xf32> -> vector<32x1xf32>
    %95 = vector.broadcast %94 : vector<32x1xf32> to vector<32x32xf32>
    %96 = arith.mulf %91, %95 : vector<32x32xf32>
    %97 = arith.truncf %96 : vector<32x32xf32> to vector<32x32xbf16>
    %cst_81 = arith.constant dense<0.000000e+00> : vector<32x8xf32>
    %98 = tpu.matmul %97, %83, %cst_81 {dimension_numbers = #tpu.dot_dimension_numbers<[1], [0], [0], [1], [0, 0, 1, 1], [], []>} : vector<32x32xbf16>, vector<32x8xbf16>, vector<32x8xf32> -> vector<32x8xf32>
    %99 = arith.truncf %98 : vector<32x8xf32> to vector<32x8xbf16>
    %c0_82 = arith.constant 0 : index
    %c0_83 = arith.constant 0 : index
    %c24 = arith.constant 24 : index
    %100 = vector.load %arg3[%c0_82, %c0_83, %c24] : memref<1x32x32xbf16, #tpu.memory_space<vmem>>, vector<1x32x8xbf16>
    %101 = vector.shape_cast %100 : vector<1x32x8xbf16> to vector<32x8xbf16>
    %102 = vector.shape_cast %99 : vector<32x8xbf16> to vector<1x32x8xbf16>
    tpu.vector_store %arg3[%c0_82, %c0_83, %c24], %102 {strides = array<i32>} : memref<1x32x32xbf16, #tpu.memory_space<vmem>>, vector<1x32x8xbf16>,
    return
  }
  func.func @transform_0(%arg0: i32, %arg1: i32) -> (i32, i32, i32, i32, i32) {
    %c0_i32 = arith.constant 0 : i32
    %c0_i32_0 = arith.constant 0 : i32
    %c0_i32_1 = arith.constant 0 : i32
    %c0_i32_2 = arith.constant 0 : i32
    return %c0_i32, %arg0, %arg1, %c0_i32_0, %c0_i32_1 : i32, i32, i32, i32, i32
  }
  func.func @transform_1(%arg0: i32, %arg1: i32) -> (i32, i32, i32) {
    %c0_i32 = arith.constant 0 : i32
    %c0_i32_0 = arith.constant 0 : i32
    return %arg0, %c0_i32, %arg1 : i32, i32, i32
  }
}

module attributes {stable_mosaic.version = 11 : i64} {
  func.func @kernel(%arg0: i32, %arg1: i32, %arg2: i32, %arg3: memref<64x32xbf16, #tpu.memory_space<vmem>>, %arg4: memref<32x32xbf16, #tpu.memory_space<vmem>>, %arg5: memref<1x32xf32, #tpu.memory_space<vmem>>, %arg6: memref<64x32xbf16, #tpu.memory_space<vmem>>, %arg7: memref<64x32xbf16, #tpu.memory_space<vmem>>) attributes {dimension_semantics = [#tpu.dimension_semantics<parallel>, #tpu.dimension_semantics<parallel>, #tpu.dimension_semantics<arbitrary>], iteration_bounds = array<i64: 1, 1, 1>, scalar_prefetch = 0 : i64, scratch_operands = 0 : i64, tpu.core_type = #tpu.core_type<tc>, window_params = [{transform_indices = @transform_0, window_bounds = array<i64: 64, 32>}, {transform_indices = @transform_1, window_bounds = array<i64: 32, 32>}, {transform_indices = @transform_2, window_bounds = array<i64: 1, 32>}, {transform_indices = @transform_3, window_bounds = array<i64: 64, 32>}, {transform_indices = @transform_4, window_bounds = array<i64: 64, 32>}]} {
    %c0 = arith.constant 0 : index
    %c0_0 = arith.constant 0 : index
    %0 = vector.load %arg3[%c0, %c0_0] : memref<64x32xbf16, #tpu.memory_space<vmem>>, vector<64x32xbf16>
    %c0_1 = arith.constant 0 : index
    %c0_2 = arith.constant 0 : index
    %1 = vector.load %arg4[%c0_1, %c0_2] : memref<32x32xbf16, #tpu.memory_space<vmem>>, vector<32x32xbf16>
    %cst = arith.constant dense<0.000000e+00> : vector<64x32xf32>
    %2 = tpu.matmul %0, %1, %cst {dimension_numbers = #tpu.dot_dimension_numbers<[1], [0], [0], [1], [0, 0, 1, 1], [], []>} : vector<64x32xbf16>, vector<32x32xbf16>, vector<64x32xf32> -> vector<64x32xf32>
    %c0_3 = arith.constant 0 : index
    %c0_4 = arith.constant 0 : index
    %3 = vector.load %arg5[%c0_3, %c0_4] : memref<1x32xf32, #tpu.memory_space<vmem>>, vector<1x32xf32>
    %4 = vector.broadcast %3 : vector<1x32xf32> to vector<64x32xf32>
    %5 = arith.addf %2, %4 : vector<64x32xf32>
    %c0_5 = arith.constant 0 : index
    %c0_6 = arith.constant 0 : index
    %6 = vector.load %arg6[%c0_5, %c0_6] : memref<64x32xbf16, #tpu.memory_space<vmem>>, vector<64x32xbf16>
    %7 = arith.extf %6 : vector<64x32xbf16> to vector<64x32xf32>
    %8 = arith.addf %5, %7 : vector<64x32xf32>
    %9 = arith.truncf %8 : vector<64x32xf32> to vector<64x32xbf16>
    %c0_7 = arith.constant 0 : index
    %c0_8 = arith.constant 0 : index
    %10 = vector.load %arg7[%c0_7, %c0_8] : memref<64x32xbf16, #tpu.memory_space<vmem>>, vector<64x32xbf16>
    tpu.vector_store %arg7[%c0_7, %c0_8], %9 {strides = array<i32>} : memref<64x32xbf16, #tpu.memory_space<vmem>>, vector<64x32xbf16>,
    return
  }
  func.func @transform_0(%arg0: i32, %arg1: i32, %arg2: i32) -> (i32, i32) {
    %c0_i32 = arith.constant 0 : i32
    return %arg0, %arg2 : i32, i32
  }
  func.func @transform_1(%arg0: i32, %arg1: i32, %arg2: i32) -> (i32, i32) {
    %c0_i32 = arith.constant 0 : i32
    return %arg2, %arg1 : i32, i32
  }
  func.func @transform_2(%arg0: i32, %arg1: i32, %arg2: i32) -> (i32, i32) {
    %c0_i32 = arith.constant 0 : i32
    %c0_i32_0 = arith.constant 0 : i32
    return %c0_i32, %arg1 : i32, i32
  }
  func.func @transform_3(%arg0: i32, %arg1: i32, %arg2: i32) -> (i32, i32) {
    %c0_i32 = arith.constant 0 : i32
    return %arg0, %arg1 : i32, i32
  }
  func.func @transform_4(%arg0: i32, %arg1: i32, %arg2: i32) -> (i32, i32) {
    %c0_i32 = arith.constant 0 : i32
    return %arg0, %arg1 : i32, i32
  }
}

module attributes {stable_mosaic.version = 11 : i64} {
  func.func @kernel(%arg0: i32, %arg1: i32, %arg2: i32, %arg3: memref<64x32xbf16, #tpu.memory_space<vmem>>, %arg4: memref<1x32xf32, #tpu.memory_space<vmem>>, %arg5: memref<1x32xf32, #tpu.memory_space<vmem>>, %arg6: memref<32x64xbf16, #tpu.memory_space<vmem>>, %arg7: memref<1x64xf32, #tpu.memory_space<vmem>>, %arg8: memref<64x64xbf16, #tpu.memory_space<vmem>>) attributes {dimension_semantics = [#tpu.dimension_semantics<parallel>, #tpu.dimension_semantics<parallel>, #tpu.dimension_semantics<arbitrary>], iteration_bounds = array<i64: 1, 1, 1>, scalar_prefetch = 0 : i64, scratch_operands = 0 : i64, tpu.core_type = #tpu.core_type<tc>, window_params = [{transform_indices = @transform_0, window_bounds = array<i64: 64, 32>}, {pipeline_mode = #tpu.pipeline_mode<synchronous>, transform_indices = @transform_1, window_bounds = array<i64: 1, 32>}, {pipeline_mode = #tpu.pipeline_mode<synchronous>, transform_indices = @transform_2, window_bounds = array<i64: 1, 32>}, {transform_indices = @transform_3, window_bounds = array<i64: 32, 64>}, {transform_indices = @transform_4, window_bounds = array<i64: 1, 64>}, {transform_indices = @transform_5, window_bounds = array<i64: 64, 64>}]} {
    %c0 = arith.constant 0 : index
    %c0_0 = arith.constant 0 : index
    %0 = vector.load %arg3[%c0, %c0_0] : memref<64x32xbf16, #tpu.memory_space<vmem>>, vector<64x32xbf16>
    %1 = arith.extf %0 : vector<64x32xbf16> to vector<64x32xf32>
    %cst = arith.constant dense<0.000000e+00> : vector<64xf32>
    %2 = vector.multi_reduction <add>, %1, %cst [1] : vector<64x32xf32> to vector<64xf32>
    %3 = vector.shape_cast %2 : vector<64xf32> to vector<64x1xf32>
    %cst_1 = arith.constant 3.200000e+01 : f32
    %4 = vector.broadcast %cst_1 : f32 to vector<64x1xf32>
    %5 = arith.divf %3, %4 : vector<64x1xf32>
    %6 = vector.broadcast %5 : vector<64x1xf32> to vector<64x32xf32>
    %7 = arith.subf %1, %6 : vector<64x32xf32>
    %8 = arith.mulf %7, %7 : vector<64x32xf32>
    %cst_2 = arith.constant dense<0.000000e+00> : vector<64xf32>
    %9 = vector.multi_reduction <add>, %8, %cst_2 [1] : vector<64x32xf32> to vector<64xf32>
    %10 = vector.shape_cast %9 : vector<64xf32> to vector<64x1xf32>
    %cst_3 = arith.constant 3.200000e+01 : f32
    %11 = vector.broadcast %cst_3 : f32 to vector<64x1xf32>
    %12 = arith.divf %10, %11 : vector<64x1xf32>
    %13 = vector.broadcast %5 : vector<64x1xf32> to vector<64x32xf32>
    %14 = arith.subf %1, %13 : vector<64x32xf32>
    %cst_4 = arith.constant 9.99999974E-6 : f32
    %15 = vector.broadcast %cst_4 : f32 to vector<64x1xf32>
    %16 = arith.addf %12, %15 : vector<64x1xf32>
    %17 = math.rsqrt %16 : vector<64x1xf32>
    %18 = vector.broadcast %17 : vector<64x1xf32> to vector<64x32xf32>
    %19 = arith.mulf %14, %18 : vector<64x32xf32>
    %c0_5 = arith.constant 0 : index
    %c0_6 = arith.constant 0 : index
    %20 = vector.load %arg4[%c0_5, %c0_6] : memref<1x32xf32, #tpu.memory_space<vmem>>, vector<1x32xf32>
    %21 = vector.broadcast %20 : vector<1x32xf32> to vector<64x32xf32>
    %22 = arith.mulf %19, %21 : vector<64x32xf32>
    %c0_7 = arith.constant 0 : index
    %c0_8 = arith.constant 0 : index
    %23 = vector.load %arg5[%c0_7, %c0_8] : memref<1x32xf32, #tpu.memory_space<vmem>>, vector<1x32xf32>
    %24 = vector.broadcast %23 : vector<1x32xf32> to vector<64x32xf32>
    %25 = arith.addf %22, %24 : vector<64x32xf32>
    %26 = arith.truncf %25 : vector<64x32xf32> to vector<64x32xbf16>
    %c0_9 = arith.constant 0 : index
    %c0_10 = arith.constant 0 : index
    %27 = vector.load %arg6[%c0_9, %c0_10] : memref<32x64xbf16, #tpu.memory_space<vmem>>, vector<32x64xbf16>
    %cst_11 = arith.constant dense<0.000000e+00> : vector<64x64xf32>
    %28 = tpu.matmul %26, %27, %cst_11 {dimension_numbers = #tpu.dot_dimension_numbers<[1], [0], [0], [1], [0, 0, 1, 1], [], []>} : vector<64x32xbf16>, vector<32x64xbf16>, vector<64x64xf32> -> vector<64x64xf32>
    %c0_12 = arith.constant 0 : index
    %c0_13 = arith.constant 0 : index
    %29 = vector.load %arg7[%c0_12, %c0_13] : memref<1x64xf32, #tpu.memory_space<vmem>>, vector<1x64xf32>
    %30 = vector.broadcast %29 : vector<1x64xf32> to vector<64x64xf32>
    %31 = arith.addf %28, %30 : vector<64x64xf32>
    %cst_14 = arith.constant 5.000000e-01 : f32
    %32 = vector.broadcast %cst_14 : f32 to vector<64x64xf32>
    %33 = arith.mulf %32, %31 : vector<64x64xf32>
    %cst_15 = arith.constant 0.707106769 : f32
    %34 = vector.broadcast %cst_15 : f32 to vector<64x64xf32>
    %35 = arith.mulf %31, %34 : vector<64x64xf32>
    %36 = math.erf %35 : vector<64x64xf32>
    %cst_16 = arith.constant 1.000000e+00 : f32
    %37 = vector.broadcast %cst_16 : f32 to vector<64x64xf32>
    %38 = arith.addf %37, %36 : vector<64x64xf32>
    %39 = arith.mulf %33, %38 : vector<64x64xf32>
    %40 = arith.truncf %39 : vector<64x64xf32> to vector<64x64xbf16>
    %c0_17 = arith.constant 0 : index
    %c0_18 = arith.constant 0 : index
    %41 = vector.load %arg8[%c0_17, %c0_18] : memref<64x64xbf16, #tpu.memory_space<vmem>>, vector<64x64xbf16>
    tpu.vector_store %arg8[%c0_17, %c0_18], %40 {strides = array<i32>} : memref<64x64xbf16, #tpu.memory_space<vmem>>, vector<64x64xbf16>,
    return
  }
  func.func @transform_0(%arg0: i32, %arg1: i32, %arg2: i32) -> (i32, i32) {
    %c0_i32 = arith.constant 0 : i32
    return %arg0, %arg2 : i32, i32
  }
  func.func @transform_1(%arg0: i32, %arg1: i32, %arg2: i32) -> (i32, i32) {
    %c0_i32 = arith.constant 0 : i32
    %c0_i32_0 = arith.constant 0 : i32
    %c0_i32_1 = arith.constant 0 : i32
    return %c0_i32, %c0_i32_0 : i32, i32
  }
  func.func @transform_2(%arg0: i32, %arg1: i32, %arg2: i32) -> (i32, i32) {
    %c0_i32 = arith.constant 0 : i32
    %c0_i32_0 = arith.constant 0 : i32
    %c0_i32_1 = arith.constant 0 : i32
    return %c0_i32, %c0_i32_0 : i32, i32
  }
  func.func @transform_3(%arg0: i32, %arg1: i32, %arg2: i32) -> (i32, i32) {
    %c0_i32 = arith.constant 0 : i32
    return %arg2, %arg1 : i32, i32
  }
  func.func @transform_4(%arg0: i32, %arg1: i32, %arg2: i32) -> (i32, i32) {
    %c0_i32 = arith.constant 0 : i32
    %c0_i32_0 = arith.constant 0 : i32
    return %c0_i32, %arg1 : i32, i32
  }
  func.func @transform_5(%arg0: i32, %arg1: i32, %arg2: i32) -> (i32, i32) {
    %c0_i32 = arith.constant 0 : i32
    return %arg0, %arg1 : i32, i32
  }
}

module attributes {stable_mosaic.version = 11 : i64} {
  func.func @kernel(%arg0: i32, %arg1: i32, %arg2: i32, %arg3: memref<64x64xbf16, #tpu.memory_space<vmem>>, %arg4: memref<64x32xbf16, #tpu.memory_space<vmem>>, %arg5: memref<1x32xf32, #tpu.memory_space<vmem>>, %arg6: memref<64x32xbf16, #tpu.memory_space<vmem>>, %arg7: memref<64x32xbf16, #tpu.memory_space<vmem>>) attributes {dimension_semantics = [#tpu.dimension_semantics<parallel>, #tpu.dimension_semantics<parallel>, #tpu.dimension_semantics<arbitrary>], iteration_bounds = array<i64: 1, 1, 1>, scalar_prefetch = 0 : i64, scratch_operands = 0 : i64, tpu.core_type = #tpu.core_type<tc>, window_params = [{transform_indices = @transform_0, window_bounds = array<i64: 64, 64>}, {transform_indices = @transform_1, window_bounds = array<i64: 64, 32>}, {transform_indices = @transform_2, window_bounds = array<i64: 1, 32>}, {transform_indices = @transform_3, window_bounds = array<i64: 64, 32>}, {transform_indices = @transform_4, window_bounds = array<i64: 64, 32>}]} {
    %c0 = arith.constant 0 : index
    %c0_0 = arith.constant 0 : index
    %0 = vector.load %arg3[%c0, %c0_0] : memref<64x64xbf16, #tpu.memory_space<vmem>>, vector<64x64xbf16>
    %c0_1 = arith.constant 0 : index
    %c0_2 = arith.constant 0 : index
    %1 = vector.load %arg4[%c0_1, %c0_2] : memref<64x32xbf16, #tpu.memory_space<vmem>>, vector<64x32xbf16>
    %cst = arith.constant dense<0.000000e+00> : vector<64x32xf32>
    %2 = tpu.matmul %0, %1, %cst {dimension_numbers = #tpu.dot_dimension_numbers<[1], [0], [0], [1], [0, 0, 1, 1], [], []>} : vector<64x64xbf16>, vector<64x32xbf16>, vector<64x32xf32> -> vector<64x32xf32>
    %c0_3 = arith.constant 0 : index
    %c0_4 = arith.constant 0 : index
    %3 = vector.load %arg5[%c0_3, %c0_4] : memref<1x32xf32, #tpu.memory_space<vmem>>, vector<1x32xf32>
    %4 = vector.broadcast %3 : vector<1x32xf32> to vector<64x32xf32>
    %5 = arith.addf %2, %4 : vector<64x32xf32>
    %c0_5 = arith.constant 0 : index
    %c0_6 = arith.constant 0 : index
    %6 = vector.load %arg6[%c0_5, %c0_6] : memref<64x32xbf16, #tpu.memory_space<vmem>>, vector<64x32xbf16>
    %7 = arith.extf %6 : vector<64x32xbf16> to vector<64x32xf32>
    %8 = arith.addf %5, %7 : vector<64x32xf32>
    %9 = arith.truncf %8 : vector<64x32xf32> to vector<64x32xbf16>
    %c0_7 = arith.constant 0 : index
    %c0_8 = arith.constant 0 : index
    %10 = vector.load %arg7[%c0_7, %c0_8] : memref<64x32xbf16, #tpu.memory_space<vmem>>, vector<64x32xbf16>
    tpu.vector_store %arg7[%c0_7, %c0_8], %9 {strides = array<i32>} : memref<64x32xbf16, #tpu.memory_space<vmem>>, vector<64x32xbf16>,
    return
  }
  func.func @transform_0(%arg0: i32, %arg1: i32, %arg2: i32) -> (i32, i32) {
    %c0_i32 = arith.constant 0 : i32
    return %arg0, %arg2 : i32, i32
  }
  func.func @transform_1(%arg0: i32, %arg1: i32, %arg2: i32) -> (i32, i32) {
    %c0_i32 = arith.constant 0 : i32
    return %arg2, %arg1 : i32, i32
  }
  func.func @transform_2(%arg0: i32, %arg1: i32, %arg2: i32) -> (i32, i32) {
    %c0_i32 = arith.constant 0 : i32
    %c0_i32_0 = arith.constant 0 : i32
    return %c0_i32, %arg1 : i32, i32
  }
  func.func @transform_3(%arg0: i32, %arg1: i32, %arg2: i32) -> (i32, i32) {
    %c0_i32 = arith.constant 0 : i32
    return %arg0, %arg1 : i32, i32
  }
  func.func @transform_4(%arg0: i32, %arg1: i32, %arg2: i32) -> (i32, i32) {
    %c0_i32 = arith.constant 0 : i32
    return %arg0, %arg1 : i32, i32
  }
}

module attributes {stable_mosaic.version = 11 : i64} {
  func.func @kernel(%arg0: i32, %arg1: i32, %arg2: i32, %arg3: memref<2x32xbf16, #tpu.memory_space<vmem>>, %arg4: memref<1x32xf32, #tpu.memory_space<vmem>>, %arg5: memref<1x32xf32, #tpu.memory_space<vmem>>, %arg6: memref<32x128xbf16, #tpu.memory_space<vmem>>, %arg7: memref<1x128xf32, #tpu.memory_space<vmem>>, %arg8: memref<2x128xf32, #tpu.memory_space<vmem>>) attributes {dimension_semantics = [#tpu.dimension_semantics<parallel>, #tpu.dimension_semantics<parallel>, #tpu.dimension_semantics<arbitrary>], iteration_bounds = array<i64: 1, 1, 1>, scalar_prefetch = 0 : i64, scratch_operands = 0 : i64, tpu.core_type = #tpu.core_type<tc>, window_params = [{transform_indices = @transform_0, window_bounds = array<i64: 2, 32>}, {pipeline_mode = #tpu.pipeline_mode<synchronous>, transform_indices = @transform_1, window_bounds = array<i64: 1, 32>}, {pipeline_mode = #tpu.pipeline_mode<synchronous>, transform_indices = @transform_2, window_bounds = array<i64: 1, 32>}, {transform_indices = @transform_3, window_bounds = array<i64: 32, 128>}, {transform_indices = @transform_4, window_bounds = array<i64: 1, 128>}, {transform_indices = @transform_5, window_bounds = array<i64: 2, 128>}]} {
    %c0 = arith.constant 0 : index
    %c0_0 = arith.constant 0 : index
    %0 = vector.load %arg3[%c0, %c0_0] : memref<2x32xbf16, #tpu.memory_space<vmem>>, vector<2x32xbf16>
    %1 = arith.extf %0 : vector<2x32xbf16> to vector<2x32xf32>
    %cst = arith.constant dense<0.000000e+00> : vector<2xf32>
    %2 = vector.multi_reduction <add>, %1, %cst [1] : vector<2x32xf32> to vector<2xf32>
    %3 = vector.shape_cast %2 : vector<2xf32> to vector<2x1xf32>
    %cst_1 = arith.constant 3.200000e+01 : f32
    %4 = vector.broadcast %cst_1 : f32 to vector<2x1xf32>
    %5 = arith.divf %3, %4 : vector<2x1xf32>
    %6 = vector.broadcast %5 : vector<2x1xf32> to vector<2x32xf32>
    %7 = arith.subf %1, %6 : vector<2x32xf32>
    %8 = arith.mulf %7, %7 : vector<2x32xf32>
    %cst_2 = arith.constant dense<0.000000e+00> : vector<2xf32>
    %9 = vector.multi_reduction <add>, %8, %cst_2 [1] : vector<2x32xf32> to vector<2xf32>
    %10 = vector.shape_cast %9 : vector<2xf32> to vector<2x1xf32>
    %cst_3 = arith.constant 3.200000e+01 : f32
    %11 = vector.broadcast %cst_3 : f32 to vector<2x1xf32>
    %12 = arith.divf %10, %11 : vector<2x1xf32>
    %13 = vector.broadcast %5 : vector<2x1xf32> to vector<2x32xf32>
    %14 = arith.subf %1, %13 : vector<2x32xf32>
    %cst_4 = arith.constant 9.99999974E-6 : f32
    %15 = vector.broadcast %cst_4 : f32 to vector<2x1xf32>
    %16 = arith.addf %12, %15 : vector<2x1xf32>
    %17 = math.rsqrt %16 : vector<2x1xf32>
    %18 = vector.broadcast %17 : vector<2x1xf32> to vector<2x32xf32>
    %19 = arith.mulf %14, %18 : vector<2x32xf32>
    %c0_5 = arith.constant 0 : index
    %c0_6 = arith.constant 0 : index
    %20 = vector.load %arg4[%c0_5, %c0_6] : memref<1x32xf32, #tpu.memory_space<vmem>>, vector<1x32xf32>
    %21 = vector.broadcast %20 : vector<1x32xf32> to vector<2x32xf32>
    %22 = arith.mulf %19, %21 : vector<2x32xf32>
    %c0_7 = arith.constant 0 : index
    %c0_8 = arith.constant 0 : index
    %23 = vector.load %arg5[%c0_7, %c0_8] : memref<1x32xf32, #tpu.memory_space<vmem>>, vector<1x32xf32>
    %24 = vector.broadcast %23 : vector<1x32xf32> to vector<2x32xf32>
    %25 = arith.addf %22, %24 : vector<2x32xf32>
    %26 = arith.truncf %25 : vector<2x32xf32> to vector<2x32xbf16>
    %c0_9 = arith.constant 0 : index
    %c0_10 = arith.constant 0 : index
    %27 = vector.load %arg6[%c0_9, %c0_10] : memref<32x128xbf16, #tpu.memory_space<vmem>>, vector<32x128xbf16>
    %cst_11 = arith.constant dense<0.000000e+00> : vector<2x128xf32>
    %28 = tpu.matmul %26, %27, %cst_11 {dimension_numbers = #tpu.dot_dimension_numbers<[1], [0], [0], [1], [0, 0, 1, 1], [], []>} : vector<2x32xbf16>, vector<32x128xbf16>, vector<2x128xf32> -> vector<2x128xf32>
    %c0_12 = arith.constant 0 : index
    %c0_13 = arith.constant 0 : index
    %29 = vector.load %arg7[%c0_12, %c0_13] : memref<1x128xf32, #tpu.memory_space<vmem>>, vector<1x128xf32>
    %30 = vector.broadcast %29 : vector<1x128xf32> to vector<2x128xf32>
    %31 = arith.addf %28, %30 : vector<2x128xf32>
    %c0_14 = arith.constant 0 : index
    %c0_15 = arith.constant 0 : index
    %32 = vector.load %arg8[%c0_14, %c0_15] : memref<2x128xf32, #tpu.memory_space<vmem>>, vector<2x128xf32>
    tpu.vector_store %arg8[%c0_14, %c0_15], %31 {strides = array<i32>} : memref<2x128xf32, #tpu.memory_space<vmem>>, vector<2x128xf32>,
    return
  }
  func.func @transform_0(%arg0: i32, %arg1: i32, %arg2: i32) -> (i32, i32) {
    %c0_i32 = arith.constant 0 : i32
    return %arg0, %arg2 : i32, i32
  }
  func.func @transform_1(%arg0: i32, %arg1: i32, %arg2: i32) -> (i32, i32) {
    %c0_i32 = arith.constant 0 : i32
    %c0_i32_0 = arith.constant 0 : i32
    %c0_i32_1 = arith.constant 0 : i32
    return %c0_i32, %c0_i32_0 : i32, i32
  }
  func.func @transform_2(%arg0: i32, %arg1: i32, %arg2: i32) -> (i32, i32) {
    %c0_i32 = arith.constant 0 : i32
    %c0_i32_0 = arith.constant 0 : i32
    %c0_i32_1 = arith.constant 0 : i32
    return %c0_i32, %c0_i32_0 : i32, i32
  }
  func.func @transform_3(%arg0: i32, %arg1: i32, %arg2: i32) -> (i32, i32) {
    %c0_i32 = arith.constant 0 : i32
    return %arg2, %arg1 : i32, i32
  }
  func.func @transform_4(%arg0: i32, %arg1: i32, %arg2: i32) -> (i32, i32) {
    %c0_i32 = arith.constant 0 : i32
    %c0_i32_0 = arith.constant 0 : i32
    return %c0_i32, %arg1 : i32, i32
  }
  func.func @transform_5(%arg0: i32, %arg1: i32, %arg2: i32) -> (i32, i32) {
    %c0_i32 = arith.constant 0 : i32
    return %arg0, %arg1 : i32, i32
  }
}

</mosaic_0001>

<bundles_post_ra>
// kernel: _lambda_.12
= control target key start
LH: loop header
LB: loop body
LE: loop exit
PB: predicated region body
PF: predicated region fallthrough
CT: control target
= control target key end

     0   :  { %vm52_vm0 = vcmask 392192   ;;  %vm124_vm1 = vcmask 257024   ;;  %s221_s1 = inlined_call_operand.vmem [shape: bf16[48,32], index: 1, kind: input, shape index: {}]   ;;  %s222_s0 = inlined_call_operand.vmem [shape: f32[32,48], index: 0, kind: input, shape index: {}]   ;;  %s223_s2 = inlined_call_operand.vmem [shape: f32[1,32], index: 2, kind: input, shape index: {}]   ;;  %s224_s3 = inlined_call_operand.vmem [shape: bf16[32,32], index: 3, kind: output, shape index: {}]  }
   0x1   :  { %v162_v0 = vld [vmem:[%s221_s1] sm:$0xff]   ;;  %v163_v1 = vld [vmem:[%s221_s1 + $0x8] sm:$0xff]   ;;  %v164_v4 = vld [vmem:[%s221_s1 + $0x10] sm:$0xff]  }
   0x2   :  { %152 = vmatprep.subr.bf16.mxu0 %v162_v0  ;;  %v15_v2 = vld [vmem:[%s222_s0] sm:$0xff]  ;;  %v16_v3 = vld [vmem:[%s222_s0 + $0x8] sm:$0xff]  ;;  %v17_v6 = vld [vmem:[%s222_s0 + $0x10] sm:$0xff] }
   0x3   :  { %153 = vmatpush3.bf16.msra.mxu0 %v162_v0  ;;  %v19_v5 = vpack.c.bf16 %v16_v3, %v15_v2  ;;  %v18_v7 = vld [vmem:[%s222_s0 + $0x18] sm:$0xff]  ;;  %v133_v9 = vld [vmem:[%s223_s2] ss:$0 sm:$0xff] }
   0x4   :  { %154 = vmatprep.subr.bf16.mxu0 %v163_v1  ;;  %v20_v8 = vpack.c.bf16 %v18_v7, %v17_v6 }
   0x5   :  { %158 = vmatprep.mubr.msk.bf16.mxu0 %vm52_vm0, %v19_v5 }
   0x7   :  { %155 = vmatpush3.bf16.msra.mxu0 %v163_v1 }
   0x8   :  { %156 = vmatprep.subr.bf16.mxu0 %v164_v4 }
   0xb   :  { %157 = vmatpush3.bf16.msra.mxu0 %v164_v4 }
   0xe   :  { %159 = vmatmul.mubr.msk.bf16.vlgmr.msra.gmra.mrb[0].mxu0 %vm52_vm0, %v20_v8 }
  0xe1   :  { %v160_v10 = vpop.f32.mrb[0].mxu0 }
  0xe2   :  { %v102_v11 = vadd.f32 %v160_v10, %v133_v9  ;;  %v93_v12 = vpop.f32.mrb[1].mxu0 }
  0xe3   :  { %v94_v13 = vadd.f32 %v133_v9, %v93_v12  ;;  %v161_v14 = vpop.f32.mrb[2].mxu0 }
  0xe4   :  { %v145_v15 = vpack.c.bf16 %v102_v11, %v102_v11  ;;  %v105_v16 = vadd.f32 %v161_v14, %v133_v9  ;;  %v96_v17 = vpop.f32.mrb[3].mxu0 }
  0xe5   :  { %v143_v18 = vpack.c.bf16 %v94_v13, %v94_v13  ;;  %v97_v19 = vadd.f32 %v133_v9, %v96_v17 }
  0xe6   :  { %127 = vst.msk [vmem:[%s224_s3 + $0x8] sm:$0xf] %vm124_vm1, %v145_v15  ;;  %v146_v20 = vpack.c.bf16 %v105_v16, %v105_v16 }
  0xe7   :  { %125 = vst.msk [vmem:[%s224_s3] sm:$0xf] %vm124_vm1, %v143_v18  ;;  %v144_v21 = vpack.c.bf16 %v97_v19, %v97_v19 }
  0xe8   :  { %128 = vst.msk [vmem:[%s224_s3 + $0xc] sm:$0xf] %vm124_vm1, %v146_v20 }
  0xe9   :  { %126 = vst.msk [vmem:[%s224_s3 + $0x4] sm:$0xf] %vm124_vm1, %v144_v21 }

// kernel: _lambda_.13
= control target key start
LH: loop header
LB: loop body
LE: loop exit
PB: predicated region body
PF: predicated region fallthrough
CT: control target
= control target key end

     0   :  { %vm37_vm0 = vcmask 261120   ;;  %vm309_vm1 = vcmask 781312   ;;  %s555_s0 = inlined_call_operand.vmem [shape: bf16[64,32], index: 0, kind: input, shape index: {}]   ;;  %s556_s3 = inlined_call_operand.vmem [shape: bf16[32,96], index: 3, kind: input, shape index: {}]   ;;  %s557_s1 = inlined_call_operand.vmem [shape: f32[1,32], index: 1, kind: input, shape index: {}]   ;;  %s558_s2 = inlined_call_operand.vmem [shape: f32[1,32], index: 2, kind: input, shape index: {}]   ;;  %s559_s4 = inlined_call_operand.vmem [shape: f32[1,96], index: 4, kind: input, shape index: {}]   ;;  %s560_s5 = inlined_call_operand.vmem [shape: bf16[64,96], index: 5, kind: output, shape index: {}]  }
   0x1   :  { %v348_v0 = vld [vmem:[%s555_s0] sm:$0xff]   ;;  %v364_v1 = vld [vmem:[%s555_s0 + $0x10] sm:$0xff]   ;;  %v363_v6 = vld [vmem:[%s555_s0 + $0x8] sm:$0xff]  }
   0x2   :  { %v349_v2 = vunpack.c.l.bf16 %v348_v0  ;;  %v357_v3 = vunpack.c.l.bf16 %v364_v1  ;;  %v350_v4 = vunpack.c.h.bf16 %v348_v0  ;;  %v358_v5 = vunpack.c.h.bf16 %v364_v1  ;;  %v365_v13 = vld [vmem:[%s555_s0 + $0x18] sm:$0xff]   ;;  %v388_v60 = vld [vmem:[%s556_s3] sm:$0xff]   ;;  %v389_v61 = vld [vmem:[%s556_s3 + $0x8] sm:$0xff]  }
   0x3   :  { %v353_v11 = vunpack.c.l.bf16 %v363_v6  ;;  %v354_v12 = vunpack.c.h.bf16 %v363_v6  ;;  %v361_v16 = vunpack.c.l.bf16 %v365_v13  ;;  %v362_v17 = vunpack.c.h.bf16 %v365_v13  ;;  %372 = vmatprep.subr.bf16.mxu0 %v388_v60  ;;  %384 = vmatprep.subr.bf16.mxu1 %v388_v60 }
   0x4   :  { %v38_v7 = vsel %vm37_vm0, %v349_v2, 0.0  ;;  %v50_v8 = vsel %vm37_vm0, %v357_v3, 0.0  ;;  %v41_v9 = vsel %vm37_vm0, %v350_v4, 0.0  ;;  %v53_v10 = vsel %vm37_vm0, %v358_v5, 0.0  ;;  %373 = vmatpush3.bf16.msra.mxu0 %v388_v60  ;;  %386 = vmatpush3.bf16.msra.mxu1 %v388_v60 }
   0x5   :  { %39 = vadd.xlane.f32.xlu0 %v38_v7  ;;  %51 = vadd.xlane.f32.xlu1 %v50_v8  ;;  %v44_v14 = vsel %vm37_vm0, %v353_v11, 0.0  ;;  %v47_v15 = vsel %vm37_vm0, %v354_v12, 0.0  ;;  %v56_v18 = vsel %vm37_vm0, %v361_v16, 0.0  ;;  %v59_v19 = vsel %vm37_vm0, %v362_v17, 0.0 }
   0x6   :  { %374 = vmatprep.subr.bf16.mxu0 %v389_v61  ;;  %385 = vmatprep.subr.bf16.mxu1 %v389_v61 }
   0x8   :  { %375 = vmatpush3.bf16.msra.mxu0 %v389_v61  ;;  %387 = vmatpush3.bf16.msra.mxu1 %v389_v61 }
   0x9   :  { %42 = vadd.xlane.f32.xlu0 %v41_v9  ;;  %54 = vadd.xlane.f32.xlu1 %v53_v10 }
   0xd   :  { %45 = vadd.xlane.f32.xlu0 %v44_v14  ;;  %48 = vadd.xlane.f32.xlu1 %v47_v15 }
  0x11   :  { %57 = vadd.xlane.f32.xlu0 %v56_v18  ;;  %60 = vadd.xlane.f32.xlu1 %v59_v19 }
  0x92   :  { %v40_v20 = vpop.xlane.xlu0 %39  ;;  %v52_v21 = vpop.xlane.xlu1 %51 }
  0x93   :  { %v63_v22 = vmul.f32 0.03125, %v40_v20  ;;  %v67_v23 = vmul.f32 0.03125, %v52_v21 }
  0x95   :  { %v456_v24 = vsub.f32 %v349_v2, %v63_v22  ;;  %v458_v25 = vsub.f32 %v357_v3, %v67_v23  ;;  %v322_v23 = vld [vmem:[%s557_s1] ss:$0 sm:$0xff] }
  0x96   :  { %v43_v26 = vpop.xlane.xlu0 %42  ;;  %v55_v27 = vpop.xlane.xlu1 %54 }
  0x97   :  { %v64_v28 = vmul.f32 0.03125, %v43_v26  ;;  %v68_v29 = vmul.f32 0.03125, %v55_v27  ;;  %v79_v30 = vmul.f32 %v456_v24, %v456_v24  ;;  %v83_v31 = vmul.f32 %v458_v25, %v458_v25 }
  0x99   :  { %v464_v32 = vsub.f32 %v350_v4, %v64_v28  ;;  %v466_v33 = vsub.f32 %v358_v5, %v68_v29  ;;  %v87_v34 = vsel %vm37_vm0, %v79_v30, 0.0  ;;  %v99_v37 = vsel %vm37_vm0, %v83_v31, 0.0  ;;  %v323_v31 = vld [vmem:[%s558_s2] ss:$0 sm:$0xff] }
  0x9a   :  { %88 = vadd.xlane.f32.xlu0 %v87_v34  ;;  %v46_v35 = vpop.xlane.xlu0 %45  ;;  %v49_v36 = vpop.xlane.xlu1 %48 }
  0x9b   :  { %v65_v38 = vmul.f32 0.03125, %v46_v35  ;;  %v66_v39 = vmul.f32 0.03125, %v49_v36  ;;  %v80_v40 = vmul.f32 %v464_v32, %v464_v32  ;;  %v84_v41 = vmul.f32 %v466_v33, %v466_v33 }
  0x9d   :  { %v474_v42 = vsub.f32 %v353_v11, %v65_v38  ;;  %v476_v43 = vsub.f32 %v354_v12, %v66_v39  ;;  %v90_v44 = vsel %vm37_vm0, %v80_v40, 0.0  ;;  %v102_v47 = vsel %vm37_vm0, %v84_v41, 0.0 }
  0x9e   :  { %100 = vadd.xlane.f32.xlu0 %v99_v37  ;;  %91 = vadd.xlane.f32.xlu1 %v90_v44  ;;  %v58_v45 = vpop.xlane.xlu0 %57  ;;  %v61_v46 = vpop.xlane.xlu1 %60 }
  0x9f   :  { %v69_v48 = vmul.f32 0.03125, %v58_v45  ;;  %v70_v49 = vmul.f32 0.03125, %v61_v46  ;;  %v81_v50 = vmul.f32 %v474_v42, %v474_v42  ;;  %v82_v51 = vmul.f32 %v476_v43, %v476_v43 }
  0xa1   :  { %v484_v52 = vsub.f32 %v361_v16, %v69_v48  ;;  %v486_v53 = vsub.f32 %v362_v17, %v70_v49  ;;  %v93_v54 = vsel %vm37_vm0, %v81_v50, 0.0  ;;  %v96_v55 = vsel %vm37_vm0, %v82_v51, 0.0 }
  0xa2   :  { %103 = vadd.xlane.f32.xlu1 %v102_v47  ;;  %94 = vadd.xlane.f32.xlu0 %v93_v54 }
  0xa3   :  { %v85_v56 = vmul.f32 %v484_v52, %v484_v52  ;;  %v86_v57 = vmul.f32 %v486_v53, %v486_v53 }
  0xa5   :  { %v105_v58 = vsel %vm37_vm0, %v85_v56, 0.0  ;;  %v108_v59 = vsel %vm37_vm0, %v86_v57, 0.0 }
  0xa6   :  { %97 = vadd.xlane.f32.xlu1 %v96_v55  ;;  %106 = vadd.xlane.f32.xlu0 %v105_v58 }
  0xaa   :  { %109 = vadd.xlane.f32.xlu1 %v108_v59 }
 0x127   :  { %v89_v62 = vpop.xlane.xlu0 %88 }
 0x128   :  { %v111_v63 = vmul.f32 0.03125, %v89_v62 }
 0x12a   :  { %v119_v0 = vadd.f32 1e-05, %v111_v63 }
 0x12b   :  { %v92_v1 = vpop.xlane.xlu1 %91  ;;  %v101_v2 = vpop.xlane.xlu0 %100 }
 0x12c   :  { %390 = vrsqrt.f32 %v119_v0  ;;  %v112_v3 = vmul.f32 0.03125, %v92_v1  ;;  %v115_v4 = vmul.f32 0.03125, %v101_v2 }
 0x12e   :  { %v120_v5 = vadd.f32 1e-05, %v112_v3  ;;  %v123_v6 = vadd.f32 1e-05, %v115_v4 }
 0x12f   :  { %v104_v7 = vpop.xlane.xlu1 %103  ;;  %v95_v8 = vpop.xlane.xlu0 %94 }
 0x130   :  { %392 = vrsqrt.f32 %v120_v5  ;;  %v116_v9 = vmul.f32 0.03125, %v104_v7  ;;  %v113_v10 = vmul.f32 0.03125, %v95_v8 }
 0x131   :  { %394 = vrsqrt.f32 %v123_v6 }
 0x132   :  { %v124_v11 = vadd.f32 1e-05, %v116_v9  ;;  %v121_v12 = vadd.f32 1e-05, %v113_v10 }
 0x133   :  { %v98_v13 = vpop.xlane.xlu1 %97  ;;  %v107_v14 = vpop.xlane.xlu0 %106 }
 0x134   :  { %396 = vrsqrt.f32 %v124_v11  ;;  %v114_v15 = vmul.f32 0.03125, %v98_v13  ;;  %v117_v16 = vmul.f32 0.03125, %v107_v14 }
 0x135   :  { %398 = vrsqrt.f32 %v121_v12 }
 0x136   :  { %v391_v17 = vpop.eup %390  ;;  %v122_v18 = vadd.f32 1e-05, %v114_v15  ;;  %v125_v19 = vadd.f32 1e-05, %v117_v16 }
 0x137   :  { %v110_v20 = vpop.xlane.xlu1 %109  ;;  %v135_v21 = vmul.f32 %v391_v17, %v456_v24 }
 0x138   :  { %400 = vrsqrt.f32 %v122_v18  ;;  %v118_v22 = vmul.f32 0.03125, %v110_v20 }
 0x139   :  { %402 = vrsqrt.f32 %v125_v19  ;;  %v150_v30 = vmul.f32 %v322_v23, %v135_v21 }
 0x13a   :  { %v393_v26 = vpop.eup %392  ;;  %v126_v27 = vadd.f32 1e-05, %v118_v22 }
 0x13b   :  { %v395_v28 = vpop.eup %394  ;;  %v136_v29 = vmul.f32 %v393_v26, %v464_v32  ;;  %v165_v37 = vadd.f32 %v323_v31, %v150_v30 }
 0x13c   :  { %404 = vrsqrt.f32 %v126_v27  ;;  %v139_v24 = vmul.f32 %v395_v28, %v458_v25 }
 0x13d   :  { %v151_v34 = vmul.f32 %v322_v23, %v136_v29 }
 0x13e   :  { %v397_v35 = vpop.eup %396  ;;  %v154_v40 = vmul.f32 %v322_v23, %v139_v24 }
 0x13f   :  { %v399_v36 = vpop.eup %398  ;;  %v166_v38 = vadd.f32 %v323_v31, %v151_v34  ;;  %v140_v39 = vmul.f32 %v397_v35, %v466_v33 }
 0x140   :  { %v137_v41 = vmul.f32 %v399_v36, %v474_v42  ;;  %v169_v48 = vadd.f32 %v323_v31, %v154_v40 }
 0x141   :  { %v173_v44 = vpack.c.bf16 %v166_v38, %v165_v37  ;;  %v155_v32 = vmul.f32 %v322_v23, %v140_v39 }
 0x142   :  { %v401_v45 = vpop.eup %400  ;;  %v152_v49 = vmul.f32 %v322_v23, %v137_v41 }
 0x143   :  { %v403_v46 = vpop.eup %402  ;;  %v138_v47 = vmul.f32 %v401_v45, %v476_v43  ;;  %376 = vmatprep.mubr.msk.bf16.mxu0 %vm37_vm0, %v173_v44  ;;  %v170_v25 = vadd.f32 %v323_v31, %v155_v32 }
 0x144   :  { %v141_v50 = vmul.f32 %v403_v46, %v484_v52  ;;  %v167_v42 = vadd.f32 %v323_v31, %v152_v49  ;;  %v324_v52 = vld [vmem:[%s559_s4] ss:$0 sm:$0xff] }
 0x145   :  { %v175_v51 = vpack.c.bf16 %v170_v25, %v169_v48  ;;  %v153_v54 = vmul.f32 %v322_v23, %v138_v47 }
 0x146   :  { %v405_v55 = vpop.eup %404  ;;  %v156_v57 = vmul.f32 %v322_v23, %v141_v50 }
 0x147   :  { %v142_v33 = vmul.f32 %v405_v55, %v486_v53  ;;  %380 = vmatprep.mubr.msk.bf16.mxu1 %vm37_vm0, %v175_v51  ;;  %v168_v56 = vadd.f32 %v323_v31, %v153_v54 }
 0x148   :  { %v171_v43 = vadd.f32 %v323_v31, %v156_v57 }
 0x149   :  { %v174_v58 = vpack.c.bf16 %v168_v56, %v167_v42  ;;  %v157_v59 = vmul.f32 %v322_v23, %v142_v33 }
 0x14b   :  { %377 = vmatmul.mubr.msk.bf16.vlgmr.msra.gmra.mrb[0].mxu0 %vm37_vm0, %v174_v58  ;;  %v172_v60 = vadd.f32 %v323_v31, %v157_v59 }
 0x14d   :  { %v176_v61 = vpack.c.bf16 %v172_v60, %v171_v43 }
 0x14f   :  { %381 = vmatmul.mubr.msk.bf16.vlgmr.msra.gmra.mrb[0].mxu1 %vm37_vm0, %v176_v61 }
 0x21e   :  { %v378_v62 = vpop.f32.mrb[0].mxu0 }
 0x21f   :  { %v255_v53 = vadd.f32 %v378_v62, %v324_v52  ;;  %v246_v63 = vpop.f32.mrb[1].mxu0 }
 0x220   :  { %v247_v0 = vadd.f32 %v324_v52, %v246_v63  ;;  %v379_v1 = vpop.f32.mrb[2].mxu0 }
 0x221   :  { %v341_v2 = vpack.c.bf16 %v255_v53, %v255_v53  ;;  %v258_v3 = vadd.f32 %v379_v1, %v324_v52  ;;  %v249_v4 = vpop.f32.mrb[3].mxu0 }
 0x222   :  { %v339_v5 = vpack.c.bf16 %v247_v0, %v247_v0  ;;  %v250_v6 = vadd.f32 %v324_v52, %v249_v4  ;;  %v382_v7 = vpop.f32.mrb[0].mxu1 }
 0x223   :  { %312 = vst.msk [vmem:[%s560_s5 + $0x8] sm:$0xf] %vm309_vm1, %v341_v2  ;;  %v342_v8 = vpack.c.bf16 %v258_v3, %v258_v3  ;;  %v271_v9 = vadd.f32 %v382_v7, %v324_v52  ;;  %v262_v10 = vpop.f32.mrb[1].mxu1 }
 0x224   :  { %310 = vst.msk [vmem:[%s560_s5] sm:$0xf] %vm309_vm1, %v339_v5  ;;  %v340_v11 = vpack.c.bf16 %v250_v6, %v250_v6  ;;  %v263_v12 = vadd.f32 %v324_v52, %v262_v10  ;;  %v383_v13 = vpop.f32.mrb[2].mxu1 }
 0x225   :  { %313 = vst.msk [vmem:[%s560_s5 + $0xc] sm:$0xf] %vm309_vm1, %v342_v8  ;;  %v345_v14 = vpack.c.bf16 %v271_v9, %v271_v9  ;;  %v274_v15 = vadd.f32 %v383_v13, %v324_v52  ;;  %v265_v16 = vpop.f32.mrb[3].mxu1 }
 0x226   :  { %311 = vst.msk [vmem:[%s560_s5 + $0x4] sm:$0xf] %vm309_vm1, %v340_v11  ;;  %v343_v17 = vpack.c.bf16 %v263_v12, %v263_v12  ;;  %v266_v18 = vadd.f32 %v324_v52, %v265_v16 }
 0x227   :  { %316 = vst.msk [vmem:[%s560_s5 + $0x18] sm:$0xf] %vm309_vm1, %v345_v14  ;;  %v346_v19 = vpack.c.bf16 %v274_v15, %v274_v15 }
 0x228   :  { %314 = vst.msk [vmem:[%s560_s5 + $0x10] sm:$0xf] %vm309_vm1, %v343_v17  ;;  %v344_v20 = vpack.c.bf16 %v266_v18, %v266_v18 }
 0x229   :  { %317 = vst.msk [vmem:[%s560_s5 + $0x1c] sm:$0xf] %vm309_vm1, %v346_v19 }
 0x22a   :  { %315 = vst.msk [vmem:[%s560_s5 + $0x14] sm:$0xf] %vm309_vm1, %v344_v20 }

// kernel: _lambda_.15
= control target key start
LH: loop header
LB: loop body
LE: loop exit
PB: predicated region body
PF: predicated region fallthrough
CT: control target
= control target key end

     0   :  { %vm69_vm0 = vcmask 261120   ;;  %vm203_vm1 = vcmask 257024   ;;  %s380_s1 = inlined_call_operand.vmem [shape: bf16[32,32], index: 1, kind: input, shape index: {}]   ;;  %s381_s0 = inlined_call_operand.vmem [shape: bf16[64,32], index: 0, kind: input, shape index: {}]   ;;  %s382_s3 = inlined_call_operand.vmem [shape: bf16[64,32], index: 3, kind: input, shape index: {}]   ;;  %s383_s2 = inlined_call_operand.vmem [shape: f32[1,32], index: 2, kind: input, shape index: {}]   ;;  %s384_s4 = inlined_call_operand.vmem [shape: bf16[64,32], index: 4, kind: output, shape index: {}]  }
   0x1   :  { %v284_v0 = vld [vmem:[%s380_s1] sm:$0xff]   ;;  %v285_v1 = vld [vmem:[%s380_s1 + $0x8] sm:$0xff]   ;;  %v287_v3 = vld [vmem:[%s381_s0 + $0x10] sm:$0xff]  }
   0x2   :  { %268 = vmatprep.subr.bf16.mxu0 %v284_v0  ;;  %280 = vmatprep.subr.bf16.mxu1 %v284_v0  ;;  %v286_v2 = vld [vmem:[%s381_s0] sm:$0xff]   ;;  %v288_v4 = vld [vmem:[%s381_s0 + $0x8] sm:$0xff]   ;;  %v289_v5 = vld [vmem:[%s381_s0 + $0x18] sm:$0xff]  }
   0x3   :  { %269 = vmatpush3.bf16.msra.mxu0 %v284_v0  ;;  %282 = vmatpush3.bf16.msra.mxu1 %v284_v0  ;;  %v259_v6 = vld [vmem:[%s382_s3 + $0x8] sm:$0xff]   ;;  %v261_v7 = vld [vmem:[%s382_s3 + $0x18] sm:$0xff]   ;;  %v244_v8 = vld [vmem:[%s382_s3] sm:$0xff]  }
   0x4   :  { %270 = vmatprep.subr.bf16.mxu0 %v285_v1  ;;  %281 = vmatprep.subr.bf16.mxu1 %v285_v1  ;;  %v260_v9 = vld [vmem:[%s382_s3 + $0x10] sm:$0xff]   ;;  %v216_v10 = vld [vmem:[%s383_s2] ss:$0 sm:$0xff]  ;;  %v249_v11 = vunpack.c.l.bf16 %v259_v6  ;;  %v257_v12 = vunpack.c.l.bf16 %v261_v7  ;;  %v245_v15 = vunpack.c.l.bf16 %v244_v8  ;;  %v250_v17 = vunpack.c.h.bf16 %v259_v6 }
   0x5   :  { %272 = vmatprep.mubr.msk.bf16.mxu0 %vm69_vm0, %v286_v2  ;;  %276 = vmatprep.mubr.msk.bf16.mxu1 %vm69_vm0, %v287_v3  ;;  %v253_v16 = vunpack.c.l.bf16 %v260_v9  ;;  %v258_v22 = vunpack.c.h.bf16 %v261_v7  ;;  %v246_v23 = vunpack.c.h.bf16 %v244_v8  ;;  %v254_v28 = vunpack.c.h.bf16 %v260_v9 }
   0x7   :  { %271 = vmatpush3.bf16.msra.mxu0 %v285_v1  ;;  %283 = vmatpush3.bf16.msra.mxu1 %v285_v1 }
   0xa   :  { %273 = vmatmul.mubr.msk.bf16.vlgmr.msra.gmra.mrb[0].mxu0 %vm69_vm0, %v288_v4  ;;  %277 = vmatmul.mubr.msk.bf16.vlgmr.msra.gmra.mrb[0].mxu1 %vm69_vm0, %v289_v5 }
  0xdd   :  { %v274_v13 = vpop.f32.mrb[0].mxu0  ;;  %v278_v14 = vpop.f32.mrb[0].mxu1 }
  0xde   :  { %v125_v18 = vadd.f32 %v274_v13, %v216_v10  ;;  %v141_v19 = vadd.f32 %v278_v14, %v216_v10  ;;  %v116_v20 = vpop.f32.mrb[1].mxu0  ;;  %v132_v21 = vpop.f32.mrb[1].mxu1 }
  0xdf   :  { %v117_v24 = vadd.f32 %v216_v10, %v116_v20  ;;  %v133_v25 = vadd.f32 %v216_v10, %v132_v21  ;;  %v275_v26 = vpop.f32.mrb[2].mxu0  ;;  %v279_v27 = vpop.f32.mrb[2].mxu1 }
  0xe0   :  { %v165_v29 = vadd.f32 %v249_v11, %v125_v18  ;;  %v169_v30 = vadd.f32 %v257_v12, %v141_v19  ;;  %v128_v31 = vadd.f32 %v275_v26, %v216_v10  ;;  %v144_v32 = vadd.f32 %v279_v27, %v216_v10  ;;  %v119_v33 = vpop.f32.mrb[3].mxu0  ;;  %v135_v34 = vpop.f32.mrb[3].mxu1 }
  0xe1   :  { %v163_v35 = vadd.f32 %v245_v15, %v117_v24  ;;  %v167_v36 = vadd.f32 %v253_v16, %v133_v25  ;;  %v120_v37 = vadd.f32 %v216_v10, %v119_v33  ;;  %v136_v38 = vadd.f32 %v216_v10, %v135_v34 }
  0xe2   :  { %v237_v39 = vpack.c.bf16 %v165_v29, %v165_v29  ;;  %v241_v40 = vpack.c.bf16 %v169_v30, %v169_v30  ;;  %v166_v41 = vadd.f32 %v250_v17, %v128_v31  ;;  %v170_v42 = vadd.f32 %v258_v22, %v144_v32 }
  0xe3   :  { %v235_v43 = vpack.c.bf16 %v163_v35, %v163_v35  ;;  %v239_v44 = vpack.c.bf16 %v167_v36, %v167_v36  ;;  %v164_v45 = vadd.f32 %v246_v23, %v120_v37  ;;  %v168_v46 = vadd.f32 %v254_v28, %v136_v38 }
  0xe4   :  { %206 = vst.msk [vmem:[%s384_s4 + $0x8] sm:$0xf] %vm203_vm1, %v237_v39  ;;  %210 = vst.msk [vmem:[%s384_s4 + $0x18] sm:$0xf] %vm203_vm1, %v241_v40  ;;  %v238_v47 = vpack.c.bf16 %v166_v41, %v166_v41  ;;  %v242_v48 = vpack.c.bf16 %v170_v42, %v170_v42 }
  0xe5   :  { %204 = vst.msk [vmem:[%s384_s4] sm:$0xf] %vm203_vm1, %v235_v43  ;;  %208 = vst.msk [vmem:[%s384_s4 + $0x10] sm:$0xf] %vm203_vm1, %v239_v44  ;;  %v236_v49 = vpack.c.bf16 %v164_v45, %v164_v45  ;;  %v240_v50 = vpack.c.bf16 %v168_v46, %v168_v46 }
  0xe6   :  { %207 = vst.msk [vmem:[%s384_s4 + $0xc] sm:$0xf] %vm203_vm1, %v238_v47  ;;  %211 = vst.msk [vmem:[%s384_s4 + $0x1c] sm:$0xf] %vm203_vm1, %v242_v48 }
  0xe7   :  { %205 = vst.msk [vmem:[%s384_s4 + $0x4] sm:$0xf] %vm203_vm1, %v236_v49  ;;  %209 = vst.msk [vmem:[%s384_s4 + $0x14] sm:$0xf] %vm203_vm1, %v240_v50 }

// kernel: _lambda_.16
= control target key start
LH: loop header
LB: loop body
LE: loop exit
PB: predicated region body
PF: predicated region fallthrough
CT: control target
= control target key end

     0   :  { %vm37_vm0 = vcmask 261120   ;;  %vm349_vm1 = vcmask 519168   ;;  %s611_s0 = inlined_call_operand.vmem [shape: bf16[64,32], index: 0, kind: input, shape index: {}]   ;;  %s612_s3 = inlined_call_operand.vmem [shape: bf16[32,64], index: 3, kind: input, shape index: {}]   ;;  %s613_s1 = inlined_call_operand.vmem [shape: f32[1,32], index: 1, kind: input, shape index: {}]   ;;  %s614_s2 = inlined_call_operand.vmem [shape: f32[1,32], index: 2, kind: input, shape index: {}]   ;;  %s615_s4 = inlined_call_operand.vmem [shape: f32[1,64], index: 4, kind: input, shape index: {}]   ;;  %s616_s5 = inlined_call_operand.vmem [shape: bf16[64,64], index: 5, kind: output, shape index: {}]  }
   0x1   :  { %v388_v0 = vld [vmem:[%s611_s0] sm:$0xff]   ;;  %v404_v1 = vld [vmem:[%s611_s0 + $0x10] sm:$0xff]   ;;  %v403_v6 = vld [vmem:[%s611_s0 + $0x8] sm:$0xff]  }
   0x2   :  { %v389_v2 = vunpack.c.l.bf16 %v388_v0  ;;  %v397_v3 = vunpack.c.l.bf16 %v404_v1  ;;  %v390_v4 = vunpack.c.h.bf16 %v388_v0  ;;  %v398_v5 = vunpack.c.h.bf16 %v404_v1  ;;  %v405_v13 = vld [vmem:[%s611_s0 + $0x18] sm:$0xff]   ;;  %v428_v60 = vld [vmem:[%s612_s3] sm:$0xff]   ;;  %v429_v61 = vld [vmem:[%s612_s3 + $0x8] sm:$0xff]  }
   0x3   :  { %v393_v11 = vunpack.c.l.bf16 %v403_v6  ;;  %v394_v12 = vunpack.c.h.bf16 %v403_v6  ;;  %v401_v16 = vunpack.c.l.bf16 %v405_v13  ;;  %v402_v17 = vunpack.c.h.bf16 %v405_v13  ;;  %412 = vmatprep.subr.bf16.mxu0 %v428_v60  ;;  %424 = vmatprep.subr.bf16.mxu1 %v428_v60 }
   0x4   :  { %v38_v7 = vsel %vm37_vm0, %v389_v2, 0.0  ;;  %v50_v8 = vsel %vm37_vm0, %v397_v3, 0.0  ;;  %v41_v9 = vsel %vm37_vm0, %v390_v4, 0.0  ;;  %v53_v10 = vsel %vm37_vm0, %v398_v5, 0.0  ;;  %413 = vmatpush3.bf16.msra.mxu0 %v428_v60  ;;  %426 = vmatpush3.bf16.msra.mxu1 %v428_v60 }
   0x5   :  { %39 = vadd.xlane.f32.xlu0 %v38_v7  ;;  %51 = vadd.xlane.f32.xlu1 %v50_v8  ;;  %v44_v14 = vsel %vm37_vm0, %v393_v11, 0.0  ;;  %v47_v15 = vsel %vm37_vm0, %v394_v12, 0.0  ;;  %v56_v18 = vsel %vm37_vm0, %v401_v16, 0.0  ;;  %v59_v19 = vsel %vm37_vm0, %v402_v17, 0.0 }
   0x6   :  { %414 = vmatprep.subr.bf16.mxu0 %v429_v61  ;;  %425 = vmatprep.subr.bf16.mxu1 %v429_v61 }
   0x8   :  { %415 = vmatpush3.bf16.msra.mxu0 %v429_v61  ;;  %427 = vmatpush3.bf16.msra.mxu1 %v429_v61 }
   0x9   :  { %42 = vadd.xlane.f32.xlu0 %v41_v9  ;;  %54 = vadd.xlane.f32.xlu1 %v53_v10 }
   0xd   :  { %45 = vadd.xlane.f32.xlu0 %v44_v14  ;;  %48 = vadd.xlane.f32.xlu1 %v47_v15 }
  0x11   :  { %57 = vadd.xlane.f32.xlu0 %v56_v18  ;;  %60 = vadd.xlane.f32.xlu1 %v59_v19 }
  0x92   :  { %v40_v20 = vpop.xlane.xlu0 %39  ;;  %v52_v21 = vpop.xlane.xlu1 %51 }
  0x93   :  { %v63_v22 = vmul.f32 0.03125, %v40_v20  ;;  %v67_v23 = vmul.f32 0.03125, %v52_v21 }
  0x95   :  { %v512_v24 = vsub.f32 %v389_v2, %v63_v22  ;;  %v514_v25 = vsub.f32 %v397_v3, %v67_v23  ;;  %v362_v23 = vld [vmem:[%s613_s1] ss:$0 sm:$0xff] }
  0x96   :  { %v43_v26 = vpop.xlane.xlu0 %42  ;;  %v55_v27 = vpop.xlane.xlu1 %54 }
  0x97   :  { %v64_v28 = vmul.f32 0.03125, %v43_v26  ;;  %v68_v29 = vmul.f32 0.03125, %v55_v27  ;;  %v79_v30 = vmul.f32 %v512_v24, %v512_v24  ;;  %v83_v31 = vmul.f32 %v514_v25, %v514_v25 }
  0x99   :  { %v520_v32 = vsub.f32 %v390_v4, %v64_v28  ;;  %v522_v33 = vsub.f32 %v398_v5, %v68_v29  ;;  %v87_v34 = vsel %vm37_vm0, %v79_v30, 0.0  ;;  %v99_v37 = vsel %vm37_vm0, %v83_v31, 0.0  ;;  %v363_v31 = vld [vmem:[%s614_s2] ss:$0 sm:$0xff] }
  0x9a   :  { %88 = vadd.xlane.f32.xlu0 %v87_v34  ;;  %v46_v35 = vpop.xlane.xlu0 %45  ;;  %v49_v36 = vpop.xlane.xlu1 %48 }
  0x9b   :  { %v65_v38 = vmul.f32 0.03125, %v46_v35  ;;  %v66_v39 = vmul.f32 0.03125, %v49_v36  ;;  %v80_v40 = vmul.f32 %v520_v32, %v520_v32  ;;  %v84_v41 = vmul.f32 %v522_v33, %v522_v33 }
  0x9d   :  { %v530_v42 = vsub.f32 %v393_v11, %v65_v38  ;;  %v532_v43 = vsub.f32 %v394_v12, %v66_v39  ;;  %v90_v44 = vsel %vm37_vm0, %v80_v40, 0.0  ;;  %v102_v47 = vsel %vm37_vm0, %v84_v41, 0.0 }
  0x9e   :  { %100 = vadd.xlane.f32.xlu0 %v99_v37  ;;  %91 = vadd.xlane.f32.xlu1 %v90_v44  ;;  %v58_v45 = vpop.xlane.xlu0 %57  ;;  %v61_v46 = vpop.xlane.xlu1 %60 }
  0x9f   :  { %v69_v48 = vmul.f32 0.03125, %v58_v45  ;;  %v70_v49 = vmul.f32 0.03125, %v61_v46  ;;  %v81_v50 = vmul.f32 %v530_v42, %v530_v42  ;;  %v82_v51 = vmul.f32 %v532_v43, %v532_v43 }
  0xa1   :  { %v540_v52 = vsub.f32 %v401_v16, %v69_v48  ;;  %v542_v53 = vsub.f32 %v402_v17, %v70_v49  ;;  %v93_v54 = vsel %vm37_vm0, %v81_v50, 0.0  ;;  %v96_v55 = vsel %vm37_vm0, %v82_v51, 0.0 }
  0xa2   :  { %103 = vadd.xlane.f32.xlu1 %v102_v47  ;;  %94 = vadd.xlane.f32.xlu0 %v93_v54 }
  0xa3   :  { %v85_v56 = vmul.f32 %v540_v52, %v540_v52  ;;  %v86_v57 = vmul.f32 %v542_v53, %v542_v53 }
  0xa5   :  { %v105_v58 = vsel %vm37_vm0, %v85_v56, 0.0  ;;  %v108_v59 = vsel %vm37_vm0, %v86_v57, 0.0 }
  0xa6   :  { %97 = vadd.xlane.f32.xlu1 %v96_v55  ;;  %106 = vadd.xlane.f32.xlu0 %v105_v58 }
  0xaa   :  { %109 = vadd.xlane.f32.xlu1 %v108_v59 }
 0x127   :  { %v89_v62 = vpop.xlane.xlu0 %88 }
 0x128   :  { %v111_v63 = vmul.f32 0.03125, %v89_v62 }
 0x12a   :  { %v119_v0 = vadd.f32 1e-05, %v111_v63 }
 0x12b   :  { %v92_v1 = vpop.xlane.xlu1 %91  ;;  %v101_v2 = vpop.xlane.xlu0 %100 }
 0x12c   :  { %430 = vrsqrt.f32 %v119_v0  ;;  %v112_v3 = vmul.f32 0.03125, %v92_v1  ;;  %v115_v4 = vmul.f32 0.03125, %v101_v2 }
 0x12e   :  { %v120_v5 = vadd.f32 1e-05, %v112_v3  ;;  %v123_v6 = vadd.f32 1e-05, %v115_v4 }
 0x12f   :  { %v104_v7 = vpop.xlane.xlu1 %103  ;;  %v95_v8 = vpop.xlane.xlu0 %94 }
 0x130   :  { %432 = vrsqrt.f32 %v120_v5  ;;  %v116_v9 = vmul.f32 0.03125, %v104_v7  ;;  %v113_v10 = vmul.f32 0.03125, %v95_v8 }
 0x131   :  { %434 = vrsqrt.f32 %v123_v6 }
 0x132   :  { %v124_v11 = vadd.f32 1e-05, %v116_v9  ;;  %v121_v12 = vadd.f32 1e-05, %v113_v10 }
 0x133   :  { %v98_v13 = vpop.xlane.xlu1 %97  ;;  %v107_v14 = vpop.xlane.xlu0 %106 }
 0x134   :  { %436 = vrsqrt.f32 %v124_v11  ;;  %v114_v15 = vmul.f32 0.03125, %v98_v13  ;;  %v117_v16 = vmul.f32 0.03125, %v107_v14 }
 0x135   :  { %438 = vrsqrt.f32 %v121_v12 }
 0x136   :  { %v431_v17 = vpop.eup %430  ;;  %v122_v18 = vadd.f32 1e-05, %v114_v15  ;;  %v125_v19 = vadd.f32 1e-05, %v117_v16 }
 0x137   :  { %v110_v20 = vpop.xlane.xlu1 %109  ;;  %v135_v21 = vmul.f32 %v431_v17, %v512_v24 }
 0x138   :  { %440 = vrsqrt.f32 %v122_v18  ;;  %v118_v22 = vmul.f32 0.03125, %v110_v20 }
 0x139   :  { %442 = vrsqrt.f32 %v125_v19  ;;  %v150_v30 = vmul.f32 %v362_v23, %v135_v21 }
 0x13a   :  { %v433_v26 = vpop.eup %432  ;;  %v126_v27 = vadd.f32 1e-05, %v118_v22 }
 0x13b   :  { %v435_v28 = vpop.eup %434  ;;  %v136_v29 = vmul.f32 %v433_v26, %v520_v32  ;;  %v165_v37 = vadd.f32 %v363_v31, %v150_v30 }
 0x13c   :  { %444 = vrsqrt.f32 %v126_v27  ;;  %v139_v24 = vmul.f32 %v435_v28, %v514_v25 }
 0x13d   :  { %v151_v34 = vmul.f32 %v362_v23, %v136_v29 }
 0x13e   :  { %v437_v35 = vpop.eup %436  ;;  %v154_v40 = vmul.f32 %v362_v23, %v139_v24 }
 0x13f   :  { %v439_v36 = vpop.eup %438  ;;  %v166_v38 = vadd.f32 %v363_v31, %v151_v34  ;;  %v140_v39 = vmul.f32 %v437_v35, %v522_v33 }
 0x140   :  { %v137_v41 = vmul.f32 %v439_v36, %v530_v42  ;;  %v169_v48 = vadd.f32 %v363_v31, %v154_v40 }
 0x141   :  { %v173_v44 = vpack.c.bf16 %v166_v38, %v165_v37  ;;  %v155_v32 = vmul.f32 %v362_v23, %v140_v39 }
 0x142   :  { %v441_v45 = vpop.eup %440  ;;  %v152_v49 = vmul.f32 %v362_v23, %v137_v41 }
 0x143   :  { %v443_v46 = vpop.eup %442  ;;  %v138_v47 = vmul.f32 %v441_v45, %v532_v43  ;;  %416 = vmatprep.mubr.msk.bf16.mxu0 %vm37_vm0, %v173_v44  ;;  %v170_v25 = vadd.f32 %v363_v31, %v155_v32 }
 0x144   :  { %v141_v50 = vmul.f32 %v443_v46, %v540_v52  ;;  %v167_v42 = vadd.f32 %v363_v31, %v152_v49  ;;  %v364_v52 = vld [vmem:[%s615_s4] ss:$0 sm:$0xff] }
 0x145   :  { %v175_v51 = vpack.c.bf16 %v170_v25, %v169_v48  ;;  %v153_v54 = vmul.f32 %v362_v23, %v138_v47 }
 0x146   :  { %v445_v55 = vpop.eup %444  ;;  %v156_v57 = vmul.f32 %v362_v23, %v141_v50 }
 0x147   :  { %v142_v33 = vmul.f32 %v445_v55, %v542_v53  ;;  %420 = vmatprep.mubr.msk.bf16.mxu1 %vm37_vm0, %v175_v51  ;;  %v168_v56 = vadd.f32 %v363_v31, %v153_v54 }
 0x148   :  { %v171_v43 = vadd.f32 %v363_v31, %v156_v57 }
 0x149   :  { %v174_v58 = vpack.c.bf16 %v168_v56, %v167_v42  ;;  %v157_v59 = vmul.f32 %v362_v23, %v142_v33 }
 0x14b   :  { %417 = vmatmul.mubr.msk.bf16.vlgmr.msra.gmra.mrb[0].mxu0 %vm37_vm0, %v174_v58  ;;  %v172_v60 = vadd.f32 %v363_v31, %v157_v59 }
 0x14d   :  { %v176_v61 = vpack.c.bf16 %v172_v60, %v171_v43 }
 0x14f   :  { %421 = vmatmul.mubr.msk.bf16.vlgmr.msra.gmra.mrb[0].mxu1 %vm37_vm0, %v176_v61 }
 0x21e   :  { %v418_v62 = vpop.f32.mrb[0].mxu0 }
 0x21f   :  { %v255_v53 = vadd.f32 %v418_v62, %v364_v52  ;;  %v246_v63 = vpop.f32.mrb[1].mxu0 }
 0x220   :  { %v247_v0 = vadd.f32 %v364_v52, %v246_v63  ;;  %v419_v1 = vpop.f32.mrb[2].mxu0 }
 0x221   :  { %v287_v2 = vmul.f32 0.70710677, %v255_v53  ;;  %v258_v3 = vadd.f32 %v419_v1, %v364_v52  ;;  %v249_v4 = vpop.f32.mrb[3].mxu0  ;;  %v279_v23 = vmul.f32 0.5, %v255_v53 }
 0x222   :  { %v285_v5 = vmul.f32 0.70710677, %v247_v0  ;;  %v250_v6 = vadd.f32 %v364_v52, %v249_v4  ;;  %v422_v7 = vpop.f32.mrb[0].mxu1  ;;  %v277_v28 = vmul.f32 0.5, %v247_v0 }
 0x223   :  { %446 = verf.f32 %v287_v2  ;;  %v288_v8 = vmul.f32 0.70710677, %v258_v3  ;;  %v271_v9 = vadd.f32 %v422_v7, %v364_v52  ;;  %v262_v10 = vpop.f32.mrb[1].mxu1  ;;  %v280_v24 = vmul.f32 0.5, %v258_v3 }
 0x224   :  { %448 = verf.f32 %v285_v5  ;;  %v286_v11 = vmul.f32 0.70710677, %v250_v6  ;;  %v263_v12 = vadd.f32 %v364_v52, %v262_v10  ;;  %v423_v13 = vpop.f32.mrb[2].mxu1  ;;  %v278_v37 = vmul.f32 0.5, %v250_v6 }
 0x225   :  { %450 = verf.f32 %v288_v8  ;;  %v291_v14 = vmul.f32 0.70710677, %v271_v9  ;;  %v274_v15 = vadd.f32 %v423_v13, %v364_v52  ;;  %v265_v16 = vpop.f32.mrb[3].mxu1  ;;  %v283_v44 = vmul.f32 0.5, %v271_v9 }
 0x226   :  { %452 = verf.f32 %v286_v11  ;;  %v289_v17 = vmul.f32 0.70710677, %v263_v12  ;;  %v266_v18 = vadd.f32 %v364_v52, %v265_v16  ;;  %v281_v48 = vmul.f32 0.5, %v263_v12 }
 0x227   :  { %454 = verf.f32 %v291_v14  ;;  %v292_v19 = vmul.f32 0.70710677, %v274_v15  ;;  %v284_v54 = vmul.f32 0.5, %v274_v15 }
 0x228   :  { %456 = verf.f32 %v289_v17  ;;  %v290_v20 = vmul.f32 0.70710677, %v266_v18  ;;  %v282_v56 = vmul.f32 0.5, %v266_v18 }
 0x229   :  { %458 = verf.f32 %v292_v19 }
 0x22a   :  { %460 = verf.f32 %v290_v20 }
 0x22d   :  { %v447_v21 = vpop.eup %446 }
 0x22e   :  { %v449_v22 = vpop.eup %448  ;;  %v303_v26 = vadd.f32 1.0, %v447_v21 }
 0x22f   :  { %v451_v27 = vpop.eup %450  ;;  %v301_v29 = vadd.f32 1.0, %v449_v22 }
 0x230   :  { %v453_v30 = vpop.eup %452  ;;  %v311_v31 = vmul.f32 %v303_v26, %v279_v23  ;;  %v304_v34 = vadd.f32 1.0, %v451_v27 }
 0x231   :  { %v455_v35 = vpop.eup %454  ;;  %v309_v36 = vmul.f32 %v301_v29, %v277_v28  ;;  %v302_v38 = vadd.f32 1.0, %v453_v30 }
 0x232   :  { %v457_v39 = vpop.eup %456  ;;  %v381_v40 = vpack.c.bf16 %v311_v31, %v311_v31  ;;  %v312_v41 = vmul.f32 %v304_v34, %v280_v24  ;;  %v307_v32 = vadd.f32 1.0, %v455_v35 }
 0x233   :  { %v459_v45 = vpop.eup %458  ;;  %v379_v46 = vpack.c.bf16 %v309_v36, %v309_v36  ;;  %v310_v47 = vmul.f32 %v302_v38, %v278_v37  ;;  %v305_v25 = vadd.f32 1.0, %v457_v39 }
 0x234   :  { %v461_v49 = vpop.eup %460  ;;  %352 = vst.msk [vmem:[%s616_s5 + $0x8] sm:$0xf] %vm349_vm1, %v381_v40  ;;  %v382_v50 = vpack.c.bf16 %v312_v41, %v312_v41  ;;  %v315_v51 = vmul.f32 %v307_v32, %v283_v44  ;;  %v308_v55 = vadd.f32 1.0, %v459_v45 }
 0x235   :  { %350 = vst.msk [vmem:[%s616_s5] sm:$0xf] %vm349_vm1, %v379_v46  ;;  %v380_v33 = vpack.c.bf16 %v310_v47, %v310_v47  ;;  %v313_v42 = vmul.f32 %v305_v25, %v281_v48  ;;  %v306_v57 = vadd.f32 1.0, %v461_v49 }
 0x236   :  { %353 = vst.msk [vmem:[%s616_s5 + $0xc] sm:$0xf] %vm349_vm1, %v382_v50  ;;  %v385_v58 = vpack.c.bf16 %v315_v51, %v315_v51  ;;  %v316_v59 = vmul.f32 %v308_v55, %v284_v54 }
 0x237   :  { %351 = vst.msk [vmem:[%s616_s5 + $0x4] sm:$0xf] %vm349_vm1, %v380_v33  ;;  %v383_v43 = vpack.c.bf16 %v313_v42, %v313_v42  ;;  %v314_v60 = vmul.f32 %v306_v57, %v282_v56 }
 0x238   :  { %356 = vst.msk [vmem:[%s616_s5 + $0x18] sm:$0xf] %vm349_vm1, %v385_v58  ;;  %v386_v61 = vpack.c.bf16 %v316_v59, %v316_v59 }
 0x239   :  { %354 = vst.msk [vmem:[%s616_s5 + $0x10] sm:$0xf] %vm349_vm1, %v383_v43  ;;  %v384_v52 = vpack.c.bf16 %v314_v60, %v314_v60 }
 0x23a   :  { %357 = vst.msk [vmem:[%s616_s5 + $0x1c] sm:$0xf] %vm349_vm1, %v386_v61 }
 0x23b   :  { %355 = vst.msk [vmem:[%s616_s5 + $0x14] sm:$0xf] %vm349_vm1, %v384_v52 }

// kernel: _lambda_.17
= control target key start
LH: loop header
LB: loop body
LE: loop exit
PB: predicated region body
PF: predicated region fallthrough
CT: control target
= control target key end

     0   :  { %vm85_vm0 = vcmask 523264   ;;  %vm219_vm1 = vcmask 257024   ;;  %s420_s1 = inlined_call_operand.vmem [shape: bf16[64,32], index: 1, kind: input, shape index: {}]   ;;  %s421_s0 = inlined_call_operand.vmem [shape: bf16[64,64], index: 0, kind: input, shape index: {}]   ;;  %s422_s3 = inlined_call_operand.vmem [shape: bf16[64,32], index: 3, kind: input, shape index: {}]   ;;  %s423_s2 = inlined_call_operand.vmem [shape: f32[1,32], index: 2, kind: input, shape index: {}]   ;;  %s424_s4 = inlined_call_operand.vmem [shape: bf16[64,32], index: 4, kind: output, shape index: {}]  }
   0x1   :  { %v312_v0 = vld [vmem:[%s420_s1] sm:$0xff]   ;;  %v313_v1 = vld [vmem:[%s420_s1 + $0x8] sm:$0xff]   ;;  %v314_v2 = vld [vmem:[%s420_s1 + $0x10] sm:$0xff]  }
   0x2   :  { %288 = vmatprep.subr.bf16.mxu0 %v312_v0  ;;  %304 = vmatprep.subr.bf16.mxu1 %v312_v0  ;;  %v316_v3 = vld [vmem:[%s421_s0] sm:$0xff]   ;;  %v317_v4 = vld [vmem:[%s421_s0 + $0x10] sm:$0xff]   ;;  %v315_v5 = vld [vmem:[%s420_s1 + $0x18] sm:$0xff]  }
   0x3   :  { %289 = vmatpush3.bf16.msra.mxu0 %v312_v0  ;;  %308 = vmatpush3.bf16.msra.mxu1 %v312_v0  ;;  %v318_v6 = vld [vmem:[%s421_s0 + $0x8] sm:$0xff]   ;;  %v319_v7 = vld [vmem:[%s421_s0 + $0x18] sm:$0xff]   ;;  %v262_v10 = vld [vmem:[%s422_s3] sm:$0xff]  }
   0x4   :  { %290 = vmatprep.subr.bf16.mxu0 %v313_v1  ;;  %305 = vmatprep.subr.bf16.mxu1 %v313_v1  ;;  %v277_v8 = vld [vmem:[%s422_s3 + $0x8] sm:$0xff]   ;;  %v279_v9 = vld [vmem:[%s422_s3 + $0x18] sm:$0xff]   ;;  %v278_v11 = vld [vmem:[%s422_s3 + $0x10] sm:$0xff]   ;;  %v263_v17 = vunpack.c.l.bf16 %v262_v10  ;;  %v264_v25 = vunpack.c.h.bf16 %v262_v10 }
   0x5   :  { %296 = vmatprep.mubr.msk.bf16.mxu0 %vm85_vm0, %v316_v3  ;;  %300 = vmatprep.mubr.msk.bf16.mxu1 %vm85_vm0, %v317_v4  ;;  %v232_v12 = vld [vmem:[%s423_s2] ss:$0 sm:$0xff]  ;;  %v267_v13 = vunpack.c.l.bf16 %v277_v8  ;;  %v275_v14 = vunpack.c.l.bf16 %v279_v9  ;;  %v271_v18 = vunpack.c.l.bf16 %v278_v11  ;;  %v268_v19 = vunpack.c.h.bf16 %v277_v8 }
   0x6   :  { %v276_v24 = vunpack.c.h.bf16 %v279_v9  ;;  %v272_v30 = vunpack.c.h.bf16 %v278_v11 }
   0x7   :  { %291 = vmatpush3.bf16.msra.mxu0 %v313_v1  ;;  %309 = vmatpush3.bf16.msra.mxu1 %v313_v1 }
   0x8   :  { %292 = vmatprep.subr.bf16.mxu0 %v314_v2  ;;  %306 = vmatprep.subr.bf16.mxu1 %v314_v2 }
   0xb   :  { %293 = vmatpush3.bf16.msra.mxu0 %v314_v2  ;;  %310 = vmatpush3.bf16.msra.mxu1 %v314_v2 }
   0xc   :  { %294 = vmatprep.subr.bf16.mxu0 %v315_v5  ;;  %307 = vmatprep.subr.bf16.mxu1 %v315_v5 }
   0xf   :  { %295 = vmatpush3.bf16.msra.mxu0 %v315_v5  ;;  %311 = vmatpush3.bf16.msra.mxu1 %v315_v5 }
  0x12   :  { %297 = vmatmul.mubr.msk.bf16.vlgmr.msra.gmra.mrb[0].mxu0 %vm85_vm0, %v318_v6  ;;  %301 = vmatmul.mubr.msk.bf16.vlgmr.msra.gmra.mrb[0].mxu1 %vm85_vm0, %v319_v7 }
  0xe5   :  { %v298_v15 = vpop.f32.mrb[0].mxu0  ;;  %v302_v16 = vpop.f32.mrb[0].mxu1 }
  0xe6   :  { %v141_v20 = vadd.f32 %v298_v15, %v232_v12  ;;  %v157_v21 = vadd.f32 %v302_v16, %v232_v12  ;;  %v132_v22 = vpop.f32.mrb[1].mxu0  ;;  %v148_v23 = vpop.f32.mrb[1].mxu1 }
  0xe7   :  { %v133_v26 = vadd.f32 %v232_v12, %v132_v22  ;;  %v149_v27 = vadd.f32 %v232_v12, %v148_v23  ;;  %v299_v28 = vpop.f32.mrb[2].mxu0  ;;  %v303_v29 = vpop.f32.mrb[2].mxu1 }
  0xe8   :  { %v181_v31 = vadd.f32 %v267_v13, %v141_v20  ;;  %v185_v32 = vadd.f32 %v275_v14, %v157_v21  ;;  %v144_v33 = vadd.f32 %v299_v28, %v232_v12  ;;  %v160_v34 = vadd.f32 %v303_v29, %v232_v12  ;;  %v135_v35 = vpop.f32.mrb[3].mxu0  ;;  %v151_v36 = vpop.f32.mrb[3].mxu1 }
  0xe9   :  { %v179_v37 = vadd.f32 %v263_v17, %v133_v26  ;;  %v183_v38 = vadd.f32 %v271_v18, %v149_v27  ;;  %v136_v39 = vadd.f32 %v232_v12, %v135_v35  ;;  %v152_v40 = vadd.f32 %v232_v12, %v151_v36 }
  0xea   :  { %v255_v41 = vpack.c.bf16 %v181_v31, %v181_v31  ;;  %v259_v42 = vpack.c.bf16 %v185_v32, %v185_v32  ;;  %v182_v43 = vadd.f32 %v268_v19, %v144_v33  ;;  %v186_v44 = vadd.f32 %v276_v24, %v160_v34 }
  0xeb   :  { %v253_v45 = vpack.c.bf16 %v179_v37, %v179_v37  ;;  %v257_v46 = vpack.c.bf16 %v183_v38, %v183_v38  ;;  %v180_v47 = vadd.f32 %v264_v25, %v136_v39  ;;  %v184_v48 = vadd.f32 %v272_v30, %v152_v40 }
  0xec   :  { %222 = vst.msk [vmem:[%s424_s4 + $0x8] sm:$0xf] %vm219_vm1, %v255_v41  ;;  %226 = vst.msk [vmem:[%s424_s4 + $0x18] sm:$0xf] %vm219_vm1, %v259_v42  ;;  %v256_v49 = vpack.c.bf16 %v182_v43, %v182_v43  ;;  %v260_v50 = vpack.c.bf16 %v186_v44, %v186_v44 }
  0xed   :  { %220 = vst.msk [vmem:[%s424_s4] sm:$0xf] %vm219_vm1, %v253_v45  ;;  %224 = vst.msk [vmem:[%s424_s4 + $0x10] sm:$0xf] %vm219_vm1, %v257_v46  ;;  %v254_v51 = vpack.c.bf16 %v180_v47, %v180_v47  ;;  %v258_v52 = vpack.c.bf16 %v184_v48, %v184_v48 }
  0xee   :  { %223 = vst.msk [vmem:[%s424_s4 + $0xc] sm:$0xf] %vm219_vm1, %v256_v49  ;;  %227 = vst.msk [vmem:[%s424_s4 + $0x1c] sm:$0xf] %vm219_vm1, %v260_v50 }
  0xef   :  { %221 = vst.msk [vmem:[%s424_s4 + $0x4] sm:$0xf] %vm219_vm1, %v254_v51  ;;  %225 = vst.msk [vmem:[%s424_s4 + $0x14] sm:$0xf] %vm219_vm1, %v258_v52 }

// kernel: _lambda_.14
= control target key start
LH: loop header
LB: loop body
LE: loop exit
PB: predicated region body
PF: predicated region fallthrough
CT: control target
= control target key end

     0   :  { %s1843_s6 = smov 0   ;;  %s1845_s7 = smov 0   ;;  %s2140_s0 = inlined_call_operand.vmem [shape: bf16[3,2,4,32,8], index: 0, kind: input, shape index: {}]   ;;  %s2141_s1 = inlined_call_operand.vmem [shape: bf16[2,32,32], index: 1, kind: output, shape index: {}]  }
   0x1   :  { %s1847_s8 = smov 0   ;;  %s1849_s9 = smov 0  }
   0x2   :  { %s1851_s10 = smov 0  }
   0x3 LB: > { %s23_s11 = sadd.s32 1, %s1824_s9  ;;  %p39_p1 = scmp.ne.s32.totalorder %s1816_s7, %s1812_s6  ;;  %s1828_s10 = sphi %s1851_s10, %s11_s10   ;;  %s1824_s9 = sphi %s1849_s9, %s2145_s9   ;;  %s1820_s8 = sphi %s1847_s8, %s2144_s8   ;;  %s1816_s7 = sphi %s1845_s7, %s2143_s7   ;;  %s1812_s6 = sphi %s1843_s6, %s2142_s6  }
   0x4   : > { %p25_p0 = scmp.ge.s32.totalorder %s23_s11, 2  ;;  %p40_p2 = scmp.eq.s32.totalorder %s1828_s10, 0 }
   0x5   : > { %s32_s13 = sadd.s32 1, %s1816_s7  ;;  %p1427_p5 = scmp.ge.s32.totalorder %s1828_s10, 2 }
   0x6   : > { %s2147_s11 = smov (%p25_p0, %s23_s11), 0  ;;  %p41_p3 = por %p40_p2, %p39_p1 }
   0x7   : > { %s27_s12 = ssub.s32 %s1824_s9, %s2147_s11  ;;  %93 = sbr.rel (%p1427_p5) target bundleno = 31 (0x1f), region = 16 }
   0x8   : > { %p30_p4 = scmp.eq.s32.totalorder %s27_s12, 0 }
   0xa   : > { %s1878_s14 = scalar_select %p30_p4, %s1816_s7, %s32_s13  }
   0xe   : > { %96 = sbr.rel (!%p41_p3) target bundleno = 31 (0x1f), region = 20  ;;  %s98_s15 = sand.u32 (%p41_p3), 1, %s1816_s7  }
   0xf   : > { %s1535_s16 = sshll.u32 (%p41_p3), %s1824_s9, 6  ;;  %s1657_s17 = smul.u32 (%p41_p3), 192, %s98_s15 }
  0x10   : > { %s1886_s20 = scalar_lea.vmem (%p41_p3), %s2140_s0, %s1535_s16 }
  0x11   : > { %v122_v0 = vld [vmem:[%s1886_s20] sm:$0xff] (%p41_p3)   ;;  %v126_v1 = vld [vmem:[%s1886_s20 + $0x8] sm:$0xff] (%p41_p3)   ;;  %v130_v2 = vld [vmem:[%s1886_s20 + $0x10] sm:$0xff] (%p41_p3)   ;;  %s1894_s21 = scalar_lea.vmem (%p41_p3), [#allocation2], %s1657_s17 }
  0x12   : > { %v134_v3 = vld [vmem:[%s1886_s20 + $0x18] sm:$0xff] (%p41_p3)   ;;  %v138_v4 = vld [vmem:[%s1886_s20 + $0x20] sm:$0xff] (%p41_p3)   ;;  %v142_v5 = vld [vmem:[%s1886_s20 + $0x28] sm:$0xff] (%p41_p3)   ;;  %123 = vst [vmem:[%s1894_s21] sm:$0xff] (%p41_p3), %v122_v0  }
  0x13   : > { %127 = vst [vmem:[%s1894_s21 + $0x8] sm:$0xff] (%p41_p3), %v126_v1   ;;  %131 = vst [vmem:[%s1894_s21 + $0x10] sm:$0xff] (%p41_p3), %v130_v2   ;;  %v146_v6 = vld [vmem:[%s1886_s20 + $0x30] sm:$0xff] (%p41_p3)   ;;  %v150_v7 = vld [vmem:[%s1886_s20 + $0x38] sm:$0xff] (%p41_p3)  }
  0x14   : > { %135 = vst [vmem:[%s1894_s21 + $0x18] sm:$0xff] (%p41_p3), %v134_v3   ;;  %139 = vst [vmem:[%s1894_s21 + $0x20] sm:$0xff] (%p41_p3), %v138_v4   ;;  %v154_v8 = vld [vmem:[%s1886_s20 + $0x80] sm:$0xff] (%p41_p3)   ;;  %v158_v9 = vld [vmem:[%s1886_s20 + $0x88] sm:$0xff] (%p41_p3)  }
  0x15   : > { %143 = vst [vmem:[%s1894_s21 + $0x28] sm:$0xff] %v142_v5   ;;  %147 = vst [vmem:[%s1894_s21 + $0x30] sm:$0xff] %v146_v6   ;;  %v162_v10 = vld [vmem:[%s1886_s20 + $0x90] sm:$0xff]   ;;  %v166_v11 = vld [vmem:[%s1886_s20 + $0x98] sm:$0xff]  }
  0x16   : > { %151 = vst [vmem:[%s1894_s21 + $0x38] sm:$0xff] %v150_v7   ;;  %155 = vst [vmem:[%s1894_s21 + $0x40] sm:$0xff] %v154_v8   ;;  %v170_v12 = vld [vmem:[%s1886_s20 + $0xa0] sm:$0xff]   ;;  %v174_v13 = vld [vmem:[%s1886_s20 + $0xa8] sm:$0xff]  }
  0x17   : > { %159 = vst [vmem:[%s1894_s21 + $0x48] sm:$0xff] %v158_v9   ;;  %163 = vst [vmem:[%s1894_s21 + $0x50] sm:$0xff] %v162_v10   ;;  %v178_v14 = vld [vmem:[%s1886_s20 + $0xb0] sm:$0xff]   ;;  %v182_v15 = vld [vmem:[%s1886_s20 + $0xb8] sm:$0xff]  }
  0x18   : > { %167 = vst [vmem:[%s1894_s21 + $0x58] sm:$0xff] %v166_v11   ;;  %171 = vst [vmem:[%s1894_s21 + $0x60] sm:$0xff] %v170_v12   ;;  %v186_v16 = vld [vmem:[%s1886_s20 + $0x100] sm:$0xff]   ;;  %v190_v17 = vld [vmem:[%s1886_s20 + $0x108] sm:$0xff]  }
  0x19   : > { %175 = vst [vmem:[%s1894_s21 + $0x68] sm:$0xff] %v174_v13   ;;  %179 = vst [vmem:[%s1894_s21 + $0x70] sm:$0xff] %v178_v14   ;;  %v194_v18 = vld [vmem:[%s1886_s20 + $0x110] sm:$0xff]   ;;  %v198_v19 = vld [vmem:[%s1886_s20 + $0x118] sm:$0xff]  }
  0x1a   : > { %183 = vst [vmem:[%s1894_s21 + $0x78] sm:$0xff] %v182_v15   ;;  %187 = vst [vmem:[%s1894_s21 + $0x80] sm:$0xff] %v186_v16   ;;  %v202_v20 = vld [vmem:[%s1886_s20 + $0x120] sm:$0xff]   ;;  %v206_v21 = vld [vmem:[%s1886_s20 + $0x128] sm:$0xff]  }
  0x1b   : > { %191 = vst [vmem:[%s1894_s21 + $0x88] sm:$0xff] %v190_v17   ;;  %195 = vst [vmem:[%s1894_s21 + $0x90] sm:$0xff] %v194_v18   ;;  %v210_v22 = vld [vmem:[%s1886_s20 + $0x130] sm:$0xff]   ;;  %v214_v23 = vld [vmem:[%s1886_s20 + $0x138] sm:$0xff]  }
  0x1c   : > { %199 = vst [vmem:[%s1894_s21 + $0x98] sm:$0xff] %v198_v19   ;;  %203 = vst [vmem:[%s1894_s21 + $0xa0] sm:$0xff] %v202_v20  }
  0x1d   : > { %207 = vst [vmem:[%s1894_s21 + $0xa8] sm:$0xff] %v206_v21   ;;  %211 = vst [vmem:[%s1894_s21 + $0xb0] sm:$0xff] %v210_v22  }
  0x1e   : > { %215 = vst [vmem:[%s1894_s21 + $0xb8] sm:$0xff] %v214_v23  }
  0x1f PF: > { %p1430_p6 = scmp.ge.s32.totalorder %s1828_s10, 1  ;;  %p335_p7 = scmp.lt.s32.totalorder %s1828_s10, 3 }
  0x21   : > { %p336_p8 = pnand %p1430_p6, %p335_p7 }
  0x22   : > { %s342_s22 = sand.u32 (!%p336_p8), 1, %s1812_s6   ;;  %vm411_vm0 = vcmask (!%p336_p8), 64512   ;;  %v374_v30 = vlaneseq (!%p336_p8)  ;;  %vm477_vm2 = vcmask (!%p336_p8), 261120   ;;  %p365_p9 = scmp.lt.s32.totalorder (!%p336_p8), %s1820_s8, 1  ;;  %vm607_vm3 = vcmask (!%p336_p8), 60416  }
  0x23   : > { %339 = sbr.rel (%p336_p8) target bundleno = 2587 (0xa1b), region = 61  ;;  %s1830_s29 = smov (!%p336_p8), 8   ;;  %vm849_vm4 = vcmask (!%p336_p8), 126016   ;;  %vm1091_vm5 = vcmask (!%p336_p8), 191616   ;;  %vm1333_vm6 = vcmask (!%p336_p8), 257216  }
  0x24   : > { %s1658_s23 = smul.u32 (!%p336_p8), 192, %s342_s22  ;;  %v1953_v31 = vand.u32 (!%p336_p8), 127, %v374_v30  ;;  %s1831_s30 = smov (!%p336_p8), 16  }
  0x25   : > { %s1832_s2 = smov (!%p336_p8), 24  }
  0x26   : > { %s1941_s24 = scalar_lea.vmem (!%p336_p8), [#allocation2], %s1658_s23  ;;  %vm376_vm1 = vcmp.lt.s32.totalorder (!%p336_p8), %v1953_v31, 17 }
  0x27   : > { %v1702_v24 = vld [vmem:[%s1941_s24 + $0x40] sm:$0xff] (!%p336_p8)   ;;  %v1703_v25 = vld [vmem:[%s1941_s24 + $0x48] sm:$0xff] (!%p336_p8)   ;;  %v1708_v2 = vld [vmem:[%s1941_s24 + $0x50] sm:$0xff] (!%p336_p8)  }
  0x28   : > { %1649 = vmatprep.subr.msk.bf16.mxu0 (!%p336_p8), %vm411_vm0, %v1702_v24  ;;  %v419_v26 = vsel (!%p336_p8), %vm411_vm0, %v1702_v24, 0  ;;  %v1704_v27 = vld [vmem:[%s1941_s24] sm:$0xff] (!%p336_p8)   ;;  %v422_v28 = vsel (!%p336_p8), %vm411_vm0, %v1703_v25, 0  ;;  %v1705_v29 = vld [vmem:[%s1941_s24 + $0x8] sm:$0xff] (!%p336_p8)   ;;  %v1710_v16 = vld [vmem:[%s1941_s24 + $0x10] sm:$0xff] (!%p336_p8)   ;;  %v654_v18 = vsel (!%p336_p8), %vm411_vm0, %v1708_v2, 0 }
  0x29   : > { %1586 = vmatpush3.bf16.xpose.msra.mxu0 (!%p336_p8), %v419_v26  ;;  %1589 = vmatprep.mubr.msk.bf16.mxu0 (!%p336_p8), %vm411_vm0, %v1704_v27  ;;  %v1706_v0 = vld [vmem:[%s1941_s24 + $0x80] sm:$0xff] (!%p336_p8)   ;;  %v1707_v1 = vld [vmem:[%s1941_s24 + $0x88] sm:$0xff] (!%p336_p8)   ;;  %v1709_v19 = vld [vmem:[%s1941_s24 + $0x58] sm:$0xff] (!%p336_p8)  }
  0x2a   : > { %1650 = vmatprep.subr.msk.bf16.mxu0 %vm411_vm0, %v1703_v25  ;;  %1593 = vmatprep.subr.bf16.mxu1 %v1706_v0  ;;  %v657_v20 = vsel %vm411_vm0, %v1709_v19, 0  ;;  %v1711_v21 = vld [vmem:[%s1941_s24 + $0x18] sm:$0xff]   ;;  %s2149_s8 = smov (!%p365_p9, %s1820_s8), 1 }
  0x2b   : > { %1594 = vmatpush3.bf16.msra.mxu1 %v1706_v0  ;;  %s1536_s25 = sshll.u32 %s2149_s8, 4  ;;  %v1713_v0 = vld [vmem:[%s1941_s24 + $0x98] sm:$0xff]  }
  0x2c   : > { %1595 = vmatprep.subr.bf16.mxu1 %v1707_v1  ;;  %s1991_s28 = scalar_lea.vmem %s2141_s1, %s1536_s25 }
  0x2f   : > { %1596 = vmatpush3.bf16.msra.mxu1 %v1707_v1  ;;  %v1714_v1 = vld [vmem:[%s1941_s24 + $0x60] sm:$0xff]  }
  0x30   : > { %1651 = vmatprep.subr.msk.bf16.mxu1 %vm411_vm0, %v1708_v2 }
  0x31   : > { %1588 = vmatpush3.bf16.xpose.msra.mxu0 %v422_v28 }
  0x38   : > { %1590 = vmatmul.mubr.msk.bf16.vlgmr.msra.gmra.mrb[0].mxu0 %vm411_vm0, %v1705_v29 }
 0x10b   : > { %v1591_v32 = vpop.f32.mrb[0].mxu0 }
 0x10c   : > { %v475_v33 = vsel %vm376_vm1, %v1591_v32, -1e+30  ;;  %v458_v34 = vpop.f32.mrb[1].mxu0 }
 0x10d   : > { %v473_v35 = vsel %vm376_vm1, %v458_v34, -1e+30  ;;  %v1592_v36 = vpop.f32.mrb[2].mxu0  ;;  %v484_v37 = vsel %vm477_vm2, %v475_v33, -inf }
 0x10e   : > { %v476_v38 = vsel %vm376_vm1, %v1592_v36, -1e+30  ;;  %485 = vmax.xlane.f32.xlu1 %v484_v37  ;;  %v461_v39 = vpop.f32.mrb[3].mxu0  ;;  %v478_v40 = vsel %vm477_vm2, %v473_v35, -inf }
 0x10f   : > { %v474_v41 = vsel %vm376_vm1, %v461_v39, -1e+30  ;;  %479 = vmax.xlane.f32.xlu0 %v478_v40  ;;  %v487_v42 = vsel %vm477_vm2, %v476_v38, -inf }
 0x110   : > { %v481_v43 = vsel %vm477_vm2, %v474_v41, -inf }
 0x112   : > { %488 = vmax.xlane.f32.xlu1 %v487_v42 }
 0x113   : > { %482 = vmax.xlane.f32.xlu0 %v481_v43 }
 0x19b   : > { %v486_v44 = vpop.xlane.xlu1 %485 }
 0x19c   : > { %v492_v45 = vsub.f32 %v475_v33, %v486_v44  ;;  %v480_v46 = vpop.xlane.xlu0 %479 }
 0x19d   : > { %v490_v47 = vsub.f32 %v473_v35, %v480_v46 }
 0x19e   : > { %v498_v48 = vmul.f32 1.442695, %v492_v45 }
 0x19f   : > { %v494_v49 = vmul.f32 1.442695, %v490_v47  ;;  %v489_v50 = vpop.xlane.xlu1 %488 }
 0x1a0   : > { %v493_v51 = vsub.f32 %v476_v38, %v489_v50  ;;  %v483_v52 = vpop.xlane.xlu0 %482 }
 0x1a1   : > { %1726 = vpow2.f32 %v494_v49  ;;  %v491_v53 = vsub.f32 %v474_v41, %v483_v52 }
 0x1a2   : > { %1728 = vpow2.f32 %v498_v48  ;;  %v500_v54 = vmul.f32 1.442695, %v493_v51 }
 0x1a3   : > { %v496_v55 = vmul.f32 1.442695, %v491_v53 }
 0x1a5   : > { %1730 = vpow2.f32 %v496_v55 }
 0x1a6   : > { %1732 = vpow2.f32 %v500_v54 }
 0x1ab   : > { %v1727_v56 = vpop.eup %1726 }
 0x1ac   : > { %v502_v57 = vsel %vm477_vm2, %v1727_v56, 0.0  ;;  %v1729_v58 = vpop.eup %1728 }
 0x1ad   : > { %503 = vadd.xlane.f32.xlu0 %v502_v57  ;;  %v508_v60 = vsel %vm477_vm2, %v1729_v58, 0.0 }
 0x1af   : > { %v1731_v59 = vpop.eup %1730 }
 0x1b0   : > { %v505_v61 = vsel %vm477_vm2, %v1731_v59, 0.0  ;;  %v1733_v62 = vpop.eup %1732 }
 0x1b1   : > { %509 = vadd.xlane.f32.xlu0 %v508_v60  ;;  %506 = vadd.xlane.f32.xlu1 %v505_v61  ;;  %v511_v63 = vsel %vm477_vm2, %v1733_v62, 0.0 }
 0x1b5   : > { %512 = vadd.xlane.f32.xlu1 %v511_v63  ;;  %v1712_v63 = vld [vmem:[%s1941_s24 + $0x90] sm:$0xff]  }
 0x1b6   : > { %1609 = vmatprep.subr.bf16.mxu0 %v1712_v63 }
 0x1b7   : > { %1610 = vmatpush3.bf16.msra.mxu0 %v1712_v63 }
 0x1b8   : > { %1611 = vmatprep.subr.bf16.mxu0 %v1713_v0 }
 0x1bb   : > { %1612 = vmatpush3.bf16.msra.mxu0 %v1713_v0 }
 0x1bc   : > { %1653 = vmatprep.subr.msk.bf16.mxu0 %vm411_vm0, %v1714_v1 }
 0x23a   : > { %v504_v3 = vpop.xlane.xlu0 %503 }
 0x23b   : > { %1734 = vrcp.f32 %v504_v3 }
 0x23e   : > { %v507_v4 = vpop.xlane.xlu1 %506  ;;  %v510_v5 = vpop.xlane.xlu0 %509 }
 0x23f   : > { %1736 = vrcp.f32 %v507_v4 }
 0x240   : > { %1738 = vrcp.f32 %v510_v5 }
 0x242   : > { %v513_v6 = vpop.xlane.xlu1 %512 }
 0x243   : > { %1740 = vrcp.f32 %v513_v6 }
 0x245   : > { %v1735_v7 = vpop.eup %1734 }
 0x246   : > { %v518_v9 = vmul.f32 %v1735_v7, %v1727_v56 }
 0x249   : > { %v1737_v8 = vpop.eup %1736 }
 0x24a   : > { %v519_v10 = vmul.f32 %v1737_v8, %v1731_v59  ;;  %v1739_v11 = vpop.eup %1738 }
 0x24b   : > { %v520_v14 = vmul.f32 %v1739_v11, %v1729_v58 }
 0x24c   : > { %v522_v12 = vpack.c.bf16 %v519_v10, %v518_v9 }
 0x24d   : > { %v1741_v13 = vpop.eup %1740 }
 0x24e   : > { %1597 = vmatprep.mubr.msk.bf16.mxu1 %vm477_vm2, %v522_v12  ;;  %v521_v15 = vmul.f32 %v1741_v13, %v1733_v62 }
 0x250   : > { %v523_v17 = vpack.c.bf16 %v521_v15, %v520_v14  ;;  %v1716_v15 = vld [vmem:[%s1941_s24 + $0x20] sm:$0xff]  }
 0x252   : > { %1598 = vmatmul.mubr.msk.bf16.vlgmr.msra.gmra.mrb[0].mxu1 %vm477_vm2, %v523_v17  ;;  %v896_v17 = vsel %vm411_vm0, %v1714_v1, 0 }
 0x253   : > { %1602 = vmatpush3.bf16.xpose.msra.mxu1 %v654_v18  ;;  %1605 = vmatprep.mubr.msk.bf16.mxu1 %vm411_vm0, %v1710_v16  ;;  %v1715_v18 = vld [vmem:[%s1941_s24 + $0x68] sm:$0xff]  }
 0x254   : > { %1652 = vmatprep.subr.msk.bf16.mxu1 %vm411_vm0, %v1709_v19  ;;  %v899_v19 = vsel %vm411_vm0, %v1715_v18, 0 }
 0x25b   : > { %1604 = vmatpush3.bf16.xpose.msra.mxu1 %v657_v20  ;;  %v1717_v20 = vld [vmem:[%s1941_s24 + $0x28] sm:$0xff]  }
 0x262   : > { %1606 = vmatmul.mubr.msk.bf16.vlgmr.msra.gmra.mrb[4].mxu1 %vm411_vm0, %v1711_v21 }
 0x325   : > { %v1599_v22 = vpop.f32.mrb[0].mxu1 }
 0x326   : > { %v1539_v23 = vpack.c.bf16 %v1599_v22, %v1599_v22  ;;  %v576_v24 = vpop.f32.mrb[1].mxu1 }
 0x327   : > { %v1537_v25 = vpack.c.bf16 %v576_v24, %v576_v24  ;;  %v1600_v26 = vpop.f32.mrb[2].mxu1 }
 0x328   : > { %610 = vst.msk [vmem:[%s1991_s28 + $0x8] sm:$0xf] %vm607_vm3, %v1539_v23  ;;  %v1540_v27 = vpack.c.bf16 %v1600_v26, %v1600_v26  ;;  %v579_v28 = vpop.f32.mrb[3].mxu1 }
 0x329   : > { %608 = vst.msk [vmem:[%s1991_s28] sm:$0xf] %vm607_vm3, %v1537_v25  ;;  %v1538_v29 = vpack.c.bf16 %v579_v28, %v579_v28 }
 0x32a   : > { %611 = vst.msk [vmem:[%s1991_s28 + $0xc] sm:$0xf] %vm607_vm3, %v1540_v27 }
 0x32b   : > { %609 = vst.msk [vmem:[%s1991_s28 + $0x4] sm:$0xf] %vm607_vm3, %v1538_v29 }
 0x335   : > { %v1607_v30 = vpop.f32.mrb[4].mxu1 }
 0x336   : > { %v693_v32 = vpop.f32.mrb[5].mxu1  ;;  %v710_v37 = vsel %vm376_vm1, %v1607_v30, -1e+30 }
 0x337   : > { %v708_v33 = vsel %vm376_vm1, %v693_v32, -1e+30  ;;  %v1608_v34 = vpop.f32.mrb[6].mxu1  ;;  %v718_v41 = vsel %vm477_vm2, %v710_v37, -inf }
 0x338   : > { %v696_v35 = vpop.f32.mrb[7].mxu1  ;;  %v712_v36 = vsel %vm477_vm2, %v708_v33, -inf  ;;  %v711_v40 = vsel %vm376_vm1, %v1608_v34, -1e+30 }
 0x339   : > { %v709_v38 = vsel %vm376_vm1, %v696_v35, -1e+30  ;;  %713 = vmax.xlane.f32.xlu0 %v712_v36  ;;  %v721_v42 = vsel %vm477_vm2, %v711_v40, -inf }
 0x33a   : > { %v715_v39 = vsel %vm477_vm2, %v709_v38, -inf }
 0x33b   : > { %716 = vmax.xlane.f32.xlu1 %v715_v39 }
 0x33d   : > { %719 = vmax.xlane.f32.xlu0 %v718_v41 }
 0x33f   : > { %722 = vmax.xlane.f32.xlu1 %v721_v42 }
 0x3c6   : > { %v714_v43 = vpop.xlane.xlu0 %713 }
 0x3c7   : > { %v724_v44 = vsub.f32 %v708_v33, %v714_v43 }
 0x3c8   : > { %v717_v45 = vpop.xlane.xlu1 %716 }
 0x3c9   : > { %v728_v46 = vmul.f32 1.442695, %v724_v44  ;;  %v725_v47 = vsub.f32 %v709_v38, %v717_v45 }
 0x3ca   : > { %v720_v48 = vpop.xlane.xlu0 %719 }
 0x3cb   : > { %1742 = vpow2.f32 %v728_v46  ;;  %v730_v49 = vmul.f32 1.442695, %v725_v47  ;;  %v726_v50 = vsub.f32 %v710_v37, %v720_v48 }
 0x3cc   : > { %v723_v51 = vpop.xlane.xlu1 %722 }
 0x3cd   : > { %1744 = vpow2.f32 %v730_v49  ;;  %v732_v52 = vmul.f32 1.442695, %v726_v50  ;;  %v727_v53 = vsub.f32 %v711_v40, %v723_v51 }
 0x3cf   : > { %1746 = vpow2.f32 %v732_v52  ;;  %v734_v54 = vmul.f32 1.442695, %v727_v53 }
 0x3d1   : > { %1748 = vpow2.f32 %v734_v54 }
 0x3d5   : > { %v1743_v55 = vpop.eup %1742 }
 0x3d6   : > { %v736_v56 = vsel %vm477_vm2, %v1743_v55, 0.0 }
 0x3d7   : > { %v1745_v57 = vpop.eup %1744  ;;  %737 = vadd.xlane.f32.xlu0 %v736_v56 }
 0x3d8   : > { %v739_v58 = vsel %vm477_vm2, %v1745_v57, 0.0 }
 0x3d9   : > { %v1747_v59 = vpop.eup %1746  ;;  %740 = vadd.xlane.f32.xlu1 %v739_v58  ;;  %v1718_v58 = vld [vmem:[%s1941_s24 + $0xa0] sm:$0xff]  }
 0x3da   : > { %v742_v60 = vsel %vm477_vm2, %v1747_v59, 0.0  ;;  %1625 = vmatprep.subr.bf16.mxu1 %v1718_v58 }
 0x3db   : > { %v1749_v61 = vpop.eup %1748  ;;  %743 = vadd.xlane.f32.xlu0 %v742_v60  ;;  %1626 = vmatpush3.bf16.msra.mxu1 %v1718_v58  ;;  %v1720_v60 = vld [vmem:[%s1941_s24 + $0x70] sm:$0xff]  }
 0x3dc   : > { %v745_v62 = vsel %vm477_vm2, %v1749_v61, 0.0 }
 0x3dd   : > { %746 = vadd.xlane.f32.xlu1 %v745_v62 }
 0x464   : > { %v738_v2 = vpop.xlane.xlu0 %737 }
 0x465   : > { %1750 = vrcp.f32 %v738_v2 }
 0x466   : > { %v741_v3 = vpop.xlane.xlu1 %740 }
 0x467   : > { %1752 = vrcp.f32 %v741_v3 }
 0x468   : > { %v744_v4 = vpop.xlane.xlu0 %743 }
 0x469   : > { %1754 = vrcp.f32 %v744_v4 }
 0x46a   : > { %v747_v5 = vpop.xlane.xlu1 %746 }
 0x46b   : > { %1756 = vrcp.f32 %v747_v5 }
 0x46f   : > { %v1751_v6 = vpop.eup %1750 }
 0x470   : > { %v752_v8 = vmul.f32 %v1751_v6, %v1743_v55 }
 0x471   : > { %v1753_v7 = vpop.eup %1752 }
 0x472   : > { %v753_v9 = vmul.f32 %v1753_v7, %v1745_v57 }
 0x473   : > { %v1755_v10 = vpop.eup %1754 }
 0x474   : > { %v756_v11 = vpack.c.bf16 %v753_v9, %v752_v8  ;;  %v754_v13 = vmul.f32 %v1755_v10, %v1747_v59  ;;  %v1719_v59 = vld [vmem:[%s1941_s24 + $0xa8] sm:$0xff]   ;;  %v1722_v10 = vld [vmem:[%s1941_s24 + $0x30] sm:$0xff]  }
 0x475   : > { %v1757_v12 = vpop.eup %1756  ;;  %1627 = vmatprep.subr.bf16.mxu1 %v1719_v59 }
 0x476   : > { %v755_v14 = vmul.f32 %v1757_v12, %v1749_v61  ;;  %1613 = vmatprep.mubr.msk.bf16.mxu0 %vm477_vm2, %v756_v11  ;;  %1628 = vmatpush3.bf16.msra.mxu1 %v1719_v59  ;;  %v1138_v12 = vsel %vm411_vm0, %v1720_v60, 0  ;;  %v1724_v59 = vld [vmem:[%s1941_s24 + $0xb0] sm:$0xff]  }
 0x477   : > { %1655 = vmatprep.subr.msk.bf16.mxu1 %vm411_vm0, %v1720_v60 }
 0x478   : > { %v757_v16 = vpack.c.bf16 %v755_v14, %v754_v13  ;;  %v1721_v13 = vld [vmem:[%s1941_s24 + $0x78] sm:$0xff]  }
 0x479   : > { %v1141_v14 = vsel %vm411_vm0, %v1721_v13, 0 }
 0x47a   : > { %1614 = vmatmul.mubr.msk.bf16.vlgmr.msra.gmra.mrb[4].mxu0 %vm477_vm2, %v757_v16 }
 0x47b   : > { %1618 = vmatpush3.bf16.xpose.msra.mxu0 %v896_v17  ;;  %1621 = vmatprep.mubr.msk.bf16.mxu0 %vm411_vm0, %v1716_v15  ;;  %v1723_v15 = vld [vmem:[%s1941_s24 + $0x38] sm:$0xff]  }
 0x47c   : > { %1654 = vmatprep.subr.msk.bf16.mxu0 %vm411_vm0, %v1715_v18 }
 0x483   : > { %1620 = vmatpush3.bf16.xpose.msra.mxu0 %v899_v19 }
 0x484   : > { %1641 = vmatprep.subr.bf16.mxu0 %v1724_v59 }
 0x48a   : > { %1622 = vmatmul.mubr.msk.bf16.vlgmr.msra.gmra.mrb[8].mxu0 %vm411_vm0, %v1717_v20 }
 0x48b   : > { %1642 = vmatpush3.bf16.msra.mxu0 %v1724_v59 }
 0x54d   : > { %v2027_v21 = vpop.f32.mrb[4].mxu0 }
 0x54e   : > { %v2029_v22 = vpop.f32.mrb[5].mxu0  ;;  %v1543_v58 = vpack.c.bf16 %v2027_v21, %v2027_v21 }
 0x54f   : > { %v2031_v23 = vpop.f32.mrb[6].mxu0 }
 0x550   : > { %v2033_v24 = vpop.f32.mrb[7].mxu0 }
 0x55d   : > { %v1623_v25 = vpop.f32.mrb[8].mxu0 }
 0x55e   : > { %v935_v26 = vpop.f32.mrb[9].mxu0  ;;  %v952_v32 = vsel %vm376_vm1, %v1623_v25, -1e+30 }
 0x55f   : > { %v950_v27 = vsel %vm376_vm1, %v935_v26, -1e+30  ;;  %v1624_v28 = vpop.f32.mrb[10].mxu0  ;;  %v960_v36 = vsel %vm477_vm2, %v952_v32, -inf }
 0x560   : > { %v938_v29 = vpop.f32.mrb[11].mxu0  ;;  %v954_v30 = vsel %vm477_vm2, %v950_v27, -inf  ;;  %v953_v35 = vsel %vm376_vm1, %v1624_v28, -1e+30 }
 0x561   : > { %v951_v33 = vsel %vm376_vm1, %v938_v29, -1e+30  ;;  %955 = vmax.xlane.f32.xlu0 %v954_v30  ;;  %v963_v37 = vsel %vm477_vm2, %v953_v35, -inf }
 0x562   : > { %v957_v34 = vsel %vm477_vm2, %v951_v33, -inf }
 0x563   : > { %958 = vmax.xlane.f32.xlu1 %v957_v34 }
 0x565   : > { %961 = vmax.xlane.f32.xlu0 %v960_v36 }
 0x567   : > { %964 = vmax.xlane.f32.xlu1 %v963_v37 }
 0x5ee   : > { %v956_v38 = vpop.xlane.xlu0 %955 }
 0x5ef   : > { %v966_v39 = vsub.f32 %v950_v27, %v956_v38 }
 0x5f0   : > { %v959_v40 = vpop.xlane.xlu1 %958 }
 0x5f1   : > { %v970_v41 = vmul.f32 1.442695, %v966_v39  ;;  %v967_v42 = vsub.f32 %v951_v33, %v959_v40 }
 0x5f2   : > { %v962_v43 = vpop.xlane.xlu0 %961 }
 0x5f3   : > { %1758 = vpow2.f32 %v970_v41  ;;  %v972_v44 = vmul.f32 1.442695, %v967_v42  ;;  %v968_v45 = vsub.f32 %v952_v32, %v962_v43 }
 0x5f4   : > { %v965_v46 = vpop.xlane.xlu1 %964 }
 0x5f5   : > { %1760 = vpow2.f32 %v972_v44  ;;  %v974_v47 = vmul.f32 1.442695, %v968_v45  ;;  %v969_v48 = vsub.f32 %v953_v35, %v965_v46 }
 0x5f7   : > { %1762 = vpow2.f32 %v974_v47  ;;  %v976_v49 = vmul.f32 1.442695, %v969_v48 }
 0x5f9   : > { %1764 = vpow2.f32 %v976_v49 }
 0x5fd   : > { %v1759_v50 = vpop.eup %1758 }
 0x5fe   : > { %v978_v51 = vsel %vm477_vm2, %v1759_v50, 0.0 }
 0x5ff   : > { %v1761_v52 = vpop.eup %1760  ;;  %979 = vadd.xlane.f32.xlu0 %v978_v51 }
 0x600   : > { %v981_v53 = vsel %vm477_vm2, %v1761_v52, 0.0 }
 0x601   : > { %v1763_v54 = vpop.eup %1762  ;;  %982 = vadd.xlane.f32.xlu1 %v981_v53 }
 0x602   : > { %v984_v55 = vsel %vm477_vm2, %v1763_v54, 0.0 }
 0x603   : > { %v1765_v56 = vpop.eup %1764  ;;  %985 = vadd.xlane.f32.xlu0 %v984_v55 }
 0x604   : > { %v987_v57 = vsel %vm477_vm2, %v1765_v56, 0.0 }
 0x605   : > { %988 = vadd.xlane.f32.xlu1 %v987_v57  ;;  %v1541_v57 = vpack.c.bf16 %v2029_v22, %v2029_v22 }
 0x68c   : > { %v980_v61 = vpop.xlane.xlu0 %979 }
 0x68d   : > { %1766 = vrcp.f32 %v980_v61  ;;  %v1544_v61 = vpack.c.bf16 %v2031_v23, %v2031_v23 }
 0x68e   : > { %v983_v62 = vpop.xlane.xlu1 %982 }
 0x68f   : > { %1768 = vrcp.f32 %v983_v62  ;;  %v1725_v62 = vld [vmem:[%s1941_s24 + $0xb8] sm:$0xff]  }
 0x690   : > { %v986_v63 = vpop.xlane.xlu0 %985  ;;  %1643 = vmatprep.subr.bf16.mxu0 %v1725_v62 }
 0x691   : > { %1770 = vrcp.f32 %v986_v63  ;;  %1644 = vmatpush3.bf16.msra.mxu0 %v1725_v62 }
 0x692   : > { %v989_v0 = vpop.xlane.xlu1 %988 }
 0x693   : > { %1772 = vrcp.f32 %v989_v0 }
 0x697   : > { %v1767_v1 = vpop.eup %1766 }
 0x698   : > { %v994_v3 = vmul.f32 %v1767_v1, %v1759_v50 }
 0x699   : > { %v1769_v2 = vpop.eup %1768 }
 0x69a   : > { %v995_v4 = vmul.f32 %v1769_v2, %v1761_v52 }
 0x69b   : > { %v1771_v5 = vpop.eup %1770 }
 0x69c   : > { %v998_v6 = vpack.c.bf16 %v995_v4, %v994_v3  ;;  %v996_v8 = vmul.f32 %v1771_v5, %v1763_v54 }
 0x69d   : > { %v1773_v7 = vpop.eup %1772 }
 0x69e   : > { %v997_v9 = vmul.f32 %v1773_v7, %v1765_v56  ;;  %1629 = vmatprep.mubr.msk.bf16.mxu1 %vm477_vm2, %v998_v6  ;;  %v1542_v56 = vpack.c.bf16 %v2033_v24, %v2033_v24 }
 0x6a0   : > { %v999_v11 = vpack.c.bf16 %v997_v9, %v996_v8 }
 0x6a2   : > { %1630 = vmatmul.mubr.msk.bf16.vlgmr.msra.gmra.mrb[8].mxu1 %vm477_vm2, %v999_v11 }
 0x6a3   : > { %1634 = vmatpush3.bf16.xpose.msra.mxu1 %v1138_v12  ;;  %1637 = vmatprep.mubr.msk.bf16.mxu1 %vm411_vm0, %v1722_v10 }
 0x6a4   : > { %1656 = vmatprep.subr.msk.bf16.mxu1 %vm411_vm0, %v1721_v13 }
 0x6ab   : > { %1636 = vmatpush3.bf16.xpose.msra.mxu1 %v1141_v14 }
 0x6b2   : > { %1638 = vmatmul.mubr.msk.bf16.vlgmr.msra.gmra.mrb[12].mxu1 %vm411_vm0, %v1723_v15 }
 0x775   : > { %v2065_v16 = vpop.f32.mrb[8].mxu1 }
 0x776   : > { %v1052_v17 = vpop.f32.mrb[9].mxu1  ;;  %v1547_v22 = vpack.c.bf16 %v2065_v16, %v2065_v16 }
 0x777   : > { %v2067_v18 = vpop.f32.mrb[10].mxu1  ;;  %v1545_v60 = vpack.c.bf16 %v1052_v17, %v1052_v17 }
 0x778   : > { %v2069_v19 = vpop.f32.mrb[11].mxu1  ;;  %v1548_v24 = vpack.c.bf16 %v2067_v18, %v2067_v18 }
 0x779   : > { %v1546_v21 = vpack.c.bf16 %v2069_v19, %v2069_v19 }
 0x785   : > { %v1639_v20 = vpop.f32.mrb[12].mxu1 }
 0x786   : > { %v1177_v25 = vpop.f32.mrb[13].mxu1  ;;  %v1194_v30 = vsel %vm376_vm1, %v1639_v20, -1e+30 }
 0x787   : > { %v1192_v26 = vsel %vm376_vm1, %v1177_v25, -1e+30  ;;  %v1640_v27 = vpop.f32.mrb[14].mxu1  ;;  %v1202_v35 = vsel %vm477_vm2, %v1194_v30, -inf }
 0x788   : > { %v1180_v28 = vpop.f32.mrb[15].mxu1  ;;  %v1196_v29 = vsel %vm477_vm2, %v1192_v26, -inf  ;;  %v1195_v34 = vsel %vm376_vm1, %v1640_v27, -1e+30 }
 0x789   : > { %v1193_v32 = vsel %vm376_vm1, %v1180_v28, -1e+30  ;;  %1197 = vmax.xlane.f32.xlu0 %v1196_v29  ;;  %v1205_v36 = vsel %vm477_vm2, %v1195_v34, -inf }
 0x78a   : > { %v1199_v33 = vsel %vm477_vm2, %v1193_v32, -inf }
 0x78b   : > { %1200 = vmax.xlane.f32.xlu1 %v1199_v33 }
 0x78d   : > { %1203 = vmax.xlane.f32.xlu0 %v1202_v35 }
 0x78f   : > { %1206 = vmax.xlane.f32.xlu1 %v1205_v36 }
 0x816   : > { %v1198_v37 = vpop.xlane.xlu0 %1197 }
 0x817   : > { %v1208_v38 = vsub.f32 %v1192_v26, %v1198_v37 }
 0x818   : > { %v1201_v39 = vpop.xlane.xlu1 %1200 }
 0x819   : > { %v1212_v40 = vmul.f32 1.442695, %v1208_v38  ;;  %v1209_v41 = vsub.f32 %v1193_v32, %v1201_v39 }
 0x81a   : > { %v1204_v42 = vpop.xlane.xlu0 %1203 }
 0x81b   : > { %1774 = vpow2.f32 %v1212_v40  ;;  %v1214_v43 = vmul.f32 1.442695, %v1209_v41  ;;  %v1210_v44 = vsub.f32 %v1194_v30, %v1204_v42 }
 0x81c   : > { %v1207_v45 = vpop.xlane.xlu1 %1206 }
 0x81d   : > { %1776 = vpow2.f32 %v1214_v43  ;;  %v1216_v31 = vmul.f32 1.442695, %v1210_v44  ;;  %v1211_v46 = vsub.f32 %v1195_v34, %v1207_v45 }
 0x81f   : > { %1778 = vpow2.f32 %v1216_v31  ;;  %v1218_v47 = vmul.f32 1.442695, %v1211_v46 }
 0x821   : > { %1780 = vpow2.f32 %v1218_v47 }
 0x825   : > { %v1775_v48 = vpop.eup %1774 }
 0x826   : > { %v1220_v49 = vsel %vm477_vm2, %v1775_v48, 0.0 }
 0x827   : > { %v1777_v50 = vpop.eup %1776  ;;  %1221 = vadd.xlane.f32.xlu0 %v1220_v49 }
 0x828   : > { %v1223_v51 = vsel %vm477_vm2, %v1777_v50, 0.0 }
 0x829   : > { %v1779_v52 = vpop.eup %1778  ;;  %1224 = vadd.xlane.f32.xlu1 %v1223_v51 }
 0x82a   : > { %v1226_v53 = vsel %vm477_vm2, %v1779_v52, 0.0 }
 0x82b   : > { %v1781_v54 = vpop.eup %1780  ;;  %1227 = vadd.xlane.f32.xlu0 %v1226_v53 }
 0x82c   : > { %v1229_v55 = vsel %vm477_vm2, %v1781_v54, 0.0 }
 0x82d   : > { %1230 = vadd.xlane.f32.xlu1 %v1229_v55 }
 0x83e   : > { %839 = vrot.lane.b32.xlu1 %v1542_v56, %s1830_s29 }
 0x841   : > { %837 = vrot.lane.b32.xlu0 %v1541_v57, %s1830_s29 }
 0x842   : > { %841 = vrot.lane.b32.xlu1 %v1543_v58, %s1830_s29 }
 0x845   : > { %1079 = vrot.lane.b32.xlu0 %v1545_v60, %s1831_s30 }
 0x846   : > { %843 = vrot.lane.b32.xlu1 %v1544_v61, %s1830_s29 }
 0x849   : > { %1083 = vrot.lane.b32.xlu0 %v1547_v22, %s1831_s30 }
 0x84a   : > { %1081 = vrot.lane.b32.xlu1 %v1546_v21, %s1831_s30 }
 0x84e   : > { %1085 = vrot.lane.b32.xlu1 %v1548_v24, %s1831_s30 }
 0x8b4   : > { %v1222_v23 = vpop.xlane.xlu0 %1221 }
 0x8b5   : > { %1782 = vrcp.f32 %v1222_v23 }
 0x8b6   : > { %v1225_v63 = vpop.xlane.xlu1 %1224 }
 0x8b7   : > { %1784 = vrcp.f32 %v1225_v63 }
 0x8b8   : > { %v1228_v0 = vpop.xlane.xlu0 %1227 }
 0x8b9   : > { %1786 = vrcp.f32 %v1228_v0 }
 0x8ba   : > { %v1231_v1 = vpop.xlane.xlu1 %1230 }
 0x8bb   : > { %1788 = vrcp.f32 %v1231_v1 }
 0x8bc   : > { %v838_v2 = vpop.permute.xlu0 %837 }
 0x8bd   : > { %850 = vst.msk [vmem:[%s1991_s28] sm:$0xf] %vm849_vm4, %v838_v2 }
 0x8be   : > { %v840_v3 = vpop.permute.xlu1 %839 }
 0x8bf   : > { %v1783_v4 = vpop.eup %1782  ;;  %851 = vst.msk [vmem:[%s1991_s28 + $0x4] sm:$0xf] %vm849_vm4, %v840_v3 }
 0x8c0   : > { %v1080_v5 = vpop.permute.xlu0 %1079  ;;  %v1236_v8 = vmul.f32 %v1783_v4, %v1775_v48 }
 0x8c1   : > { %v1785_v6 = vpop.eup %1784  ;;  %1092 = vst.msk [vmem:[%s1991_s28] sm:$0xf] %vm1091_vm5, %v1080_v5 }
 0x8c2   : > { %v842_v7 = vpop.permute.xlu1 %841  ;;  %v1237_v9 = vmul.f32 %v1785_v6, %v1777_v50 }
 0x8c3   : > { %v1787_v10 = vpop.eup %1786  ;;  %852 = vst.msk [vmem:[%s1991_s28 + $0x8] sm:$0xf] %vm849_vm4, %v842_v7 }
 0x8c4   : > { %v1084_v11 = vpop.permute.xlu0 %1083  ;;  %v1240_v12 = vpack.c.bf16 %v1237_v9, %v1236_v8  ;;  %v1238_v14 = vmul.f32 %v1787_v10, %v1779_v52 }
 0x8c5   : > { %v1789_v13 = vpop.eup %1788  ;;  %1094 = vst.msk [vmem:[%s1991_s28 + $0x8] sm:$0xf] %vm1091_vm5, %v1084_v11 }
 0x8c6   : > { %v1239_v15 = vmul.f32 %v1789_v13, %v1781_v54  ;;  %1645 = vmatprep.mubr.msk.bf16.mxu0 %vm477_vm2, %v1240_v12  ;;  %v844_v16 = vpop.permute.xlu1 %843 }
 0x8c7   : > { %853 = vst.msk [vmem:[%s1991_s28 + $0xc] sm:$0xf] %vm849_vm4, %v844_v16 }
 0x8c8   : > { %v1241_v17 = vpack.c.bf16 %v1239_v15, %v1238_v14 }
 0x8ca   : > { %1646 = vmatmul.mubr.msk.bf16.vlgmr.msra.gmra.mrb[12].mxu0 %vm477_vm2, %v1241_v17  ;;  %v1082_v18 = vpop.permute.xlu1 %1081 }
 0x8cb   : > { %1093 = vst.msk [vmem:[%s1991_s28 + $0x4] sm:$0xf] %vm1091_vm5, %v1082_v18 }
 0x8ce   : > { %v1086_v19 = vpop.permute.xlu1 %1085 }
 0x8cf   : > { %1095 = vst.msk [vmem:[%s1991_s28 + $0xc] sm:$0xf] %vm1091_vm5, %v1086_v19 }
 0x99d   : > { %v1647_v20 = vpop.f32.mrb[12].mxu0 }
 0x99e   : > { %v1294_v25 = vpop.f32.mrb[13].mxu0  ;;  %v1551_v30 = vpack.c.bf16 %v1647_v20, %v1647_v20 }
 0x99f   : > { %v1549_v26 = vpack.c.bf16 %v1294_v25, %v1294_v25  ;;  %v1648_v27 = vpop.f32.mrb[14].mxu0 }
 0x9a0   : > { %v1297_v28 = vpop.f32.mrb[15].mxu0  ;;  %v1552_v32 = vpack.c.bf16 %v1648_v27, %v1648_v27 }
 0x9a1   : > { %v1550_v29 = vpack.c.bf16 %v1297_v28, %v1297_v28  ;;  %1321 = vrot.lane.b32.xlu0 %v1549_v26, %s1832_s2 }
 0x9a3   : > { %1323 = vrot.lane.b32.xlu1 %v1550_v29, %s1832_s2 }
 0x9a5   : > { %1325 = vrot.lane.b32.xlu0 %v1551_v30, %s1832_s2 }
 0x9a7   : > { %1327 = vrot.lane.b32.xlu1 %v1552_v32, %s1832_s2 }
 0xa13   : > { %v1322_v33 = vpop.permute.xlu0 %1321 }
 0xa14   : > { %1334 = vst.msk [vmem:[%s1991_s28] sm:$0xf] %vm1333_vm6, %v1322_v33 }
 0xa15   : > { %v1324_v34 = vpop.permute.xlu1 %1323 }
 0xa16   : > { %1335 = vst.msk [vmem:[%s1991_s28 + $0x4] sm:$0xf] %vm1333_vm6, %v1324_v34 }
 0xa17   : > { %v1326_v35 = vpop.permute.xlu0 %1325 }
 0xa18   : > { %1336 = vst.msk [vmem:[%s1991_s28 + $0x8] sm:$0xf] %vm1333_vm6, %v1326_v35 }
 0xa19   : > { %v1328_v36 = vpop.permute.xlu1 %1327 }
 0xa1a   : > { %1337 = vst.msk [vmem:[%s1991_s28 + $0xc] sm:$0xf] %vm1333_vm6, %v1328_v36 }
 0xa1b PF: > { %s11_s10 = sadd.s32 1, %s1828_s10   ;;  %s2142_s6 = smov %s1816_s7 }
 0xa1c   : > { %p8_p10 = scmp.ge.s32.totalorder %s11_s10, 4   ;;  %s2143_s7 = smov %s1878_s14 }
 0xa1d   : > { %s2144_s8 = smov %s1824_s9  ;;  %s2145_s9 = smov %s2147_s11 }
 0xa1e   :  { %10 = sbr.rel (!%p8_p10) target bundleno = 3 (0x3), region = 111 }

// kernel: _lambda_.23
= control target key start
LH: loop header
LB: loop body
LE: loop exit
PB: predicated region body
PF: predicated region fallthrough
CT: control target
= control target key end

     0   :  { %vm24_vm0 = vcmask 254976   ;;  %s249_s0 = inlined_call_operand.vmem [shape: bf16[2,32], index: 0, kind: input, shape index: {}]   ;;  %s250_s1 = inlined_call_operand.vmem [shape: f32[1,32], index: 1, kind: input, shape index: {}]   ;;  %s251_s2 = inlined_call_operand.vmem [shape: f32[1,32], index: 2, kind: input, shape index: {}]   ;;  %s252_s3 = inlined_call_operand.vmem [shape: bf16[32,128], index: 3, kind: input, shape index: {}]   ;;  %s253_s4 = inlined_call_operand.vmem [shape: f32[1,128], index: 4, kind: input, shape index: {}]   ;;  %s254_s5 = inlined_call_operand.hbm [shape: f32[2,128], index: 5, kind: output, shape index: {}]  }
   0x1   :  { %v22_v0 = vld [vmem:[%s249_s0] sm:$0x1] }
   0x2   :  { %v23_v1 = vunpack.c.l.bf16 %v22_v0 }
   0x3   :  { %10 = vsyncpa [#allocation3], 0  ;;  %v158_v8 = vld [vmem:[%s252_s3] sm:$0xff]   ;;  %v186_v9 = vmov 0.0   ;;  %v159_v10 = vld [vmem:[%s252_s3 + $0x8] sm:$0xff]   ;;  %vm187_vm1 = vmmov 0  }
   0x4   :  { %v25_v2 = vsel %vm24_vm0, %v23_v1, 0.0  ;;  %147 = vmatprep.subr.bf16.mxu0 %v186_v9  ;;  %151 = vmatprep.mubr.msk.bf16.mxu0 %vm187_vm1, %v186_v9  ;;  %v138_v15 = vld [vmem:[%s250_s1] ss:$0 sm:$0xff]  ;;  %vm79_vm2 = vcmask 261120   ;;  %s188_s28 = smov [#allocation2]  }
   0x5   :  { %26 = vadd.xlane.f32.xlu0 %v25_v2  ;;  %148 = vmatpush3.bf16.msra.mxu0 %v158_v8  ;;  %v139_v17 = vld [vmem:[%s251_s2] ss:$0 sm:$0xff]  ;;  %s130_s29 = sshll.u32 %s188_s28, 4  ;;  %s131_s29 = int_to_ptr.vmem [resolvable:$true] %s130_s29 }
   0x6   :  { %149 = vmatprep.subr.bf16.mxu0 %v186_v9  ;;  %v140_v21 = vld [vmem:[%s253_s4] ss:$0 sm:$0xff]  ;;  %s162_s1 = scalar_lea.vmem %s131_s29, 32  ;;  %p167_p1 = scmp.lt.s32.totalorder %s131_s29, %s131_s29 }
   0x7   :  { %p163_p0 = scmp.ne.s32.totalorder %s131_s29, %s162_s1  ;;  %p168_p2 = scmp.lt.s32.totalorder %s162_s1, %s162_s1 }
   0x9   :  { %150 = vmatpush3.bf16.msra.mxu0 %v159_v10  ;;  %p169_p3 = por %p168_p2, %p167_p1 }
   0xb   :  { %p170_p4 = pnand %p169_p3, %p163_p0 }
  0x92   :  { %v27_v3 = vpop.xlane.xlu0 %26 }
  0x93   :  { %v29_v4 = vmul.f32 0.03125, %v27_v3 }
  0x95   :  { %v30_v5 = vsub.f32 %v23_v1, %v29_v4 }
  0x97   :  { %v31_v6 = vmul.f32 %v30_v5, %v30_v5 }
  0x99   :  { %v32_v7 = vsel %vm24_vm0, %v31_v6, 0.0 }
  0x9a   :  { %33 = vadd.xlane.f32.xlu0 %v32_v7 }
 0x127   :  { %v34_v11 = vpop.xlane.xlu0 %33 }
 0x128   :  { %v35_v12 = vmul.f32 0.03125, %v34_v11 }
 0x12a   :  { %v36_v13 = vadd.f32 1e-05, %v35_v12 }
 0x12c   :  { %160 = vrsqrt.f32 %v36_v13 }
 0x136   :  { %v161_v14 = vpop.eup %160 }
 0x137   :  { %v38_v16 = vmul.f32 %v161_v14, %v30_v5 }
 0x139   :  { %v46_v18 = vmul.f32 %v138_v15, %v38_v16 }
 0x13b   :  { %v54_v19 = vadd.f32 %v139_v17, %v46_v18 }
 0x13d   :  { %v55_v20 = vpack.c.bf16 %v54_v19, %v54_v19 }
 0x13f   :  { %152 = vmatmul.mubr.msk.bf16.vlgmr.msra.gmra.mrb[0].mxu0 %vm79_vm2, %v55_v20 }
 0x212   :  { %v117_v22 = vpop.f32.mrb[0].mxu0 }
 0x213   :  { %v118_v23 = vadd.f32 %v140_v21, %v117_v22  ;;  %v153_v24 = vpop.f32.mrb[1].mxu0 }
 0x214   :  { %v120_v25 = vpop.f32.mrb[2].mxu0 }
 0x215   :  { %123 = vst [vmem:[#allocation2] sm:$0x3] %v118_v23  ;;  %v154_v26 = vpop.f32.mrb[3].mxu0 }
 0x216   :  { %173 = shalt.err (!%p170_p4)
}
 0x217   :  { %s174_s4 = scalar_lea.hbm %s254_s5, 32 }
 0x218   :  { %p175_p5 = scmp.ne.s32.totalorder %s254_s5, %s174_s4  ;;  %p178_p6 = scmp.lt.u32.totalorder %s174_s4, %s254_s5 }
 0x21a   :  { %p180_p7 = pnand %p178_p6, %p175_p5 }
 0x21c   :  { %183 = shalt.err (!%p180_p7)
}
 0x21d   :  { %133 = dma.vmem_to_hbm [thread:$0]  %s131_s29, 32, %s254_s5, [#allocation3]  }
 0x21e   :  { %184 = dma.done.wait [#allocation3], 32  }
 0x21f   :  { %185 = vsyncadd [#allocation3], 4294967264 }
 0x220   :  { %137 = vsyncpa [#allocation3], 1 }

</bundles_post_ra>
